<compile_context>
chip_gen: v5e
topology: v5e:2x2
jax: 0.10.0
libtpu: 0.0.40
codegen_flags: <defaults>
</compile_context>

<pallas_src>
import jax
import jax.numpy as jnp
from jax.experimental import pallas as pl
from jax.experimental.pallas import tpu as pltpu

H1 = 512
H2 = 256

# Conservative VMEM budget (stay under v5e's 16 MiB scoped default with headroom).
_VMEM_BUDGET = 12 * 1024 * 1024


def mlp_kernel(x_ref, w1_ref, b1_ref, w2_ref, b2_ref, w3_ref, b3_ref, o_ref):
    # Layer 1: Linear(D, 512) + ReLU  (bf16 MXU matmul, f32 accumulation).
    x = x_ref[...]
    if x.dtype != jnp.bfloat16:          # no-op when the caller supplies bf16
        x = x.astype(jnp.bfloat16)
    h1 = jnp.dot(x, w1_ref[...], preferred_element_type=jnp.float32)
    h1 = jnp.maximum(h1 + b1_ref[...], 0.0)

    # Layer 2: Linear(512, 256) + ReLU.
    h2 = jnp.dot(h1.astype(jnp.bfloat16), w2_ref[...],
                 preferred_element_type=jnp.float32)
    h2 = jnp.maximum(h2 + b2_ref[...], 0.0)

    # Layer 3: Linear(256, 1) + Sigmoid on the VPU/XLU (avoid an N=1 MXU matmul).
    # w3 is lane-dense (1, H2); reduce over lanes -> one logit per batch row.
    logits = jnp.sum(h2 * w3_ref[...], axis=-1)[None, :] + b3_ref[0]   # (1, tile_b)
    out = jax.nn.sigmoid(logits)
    o_ref[...] = out.reshape(o_ref.shape).astype(o_ref.dtype)          # (1, 1, tile_b)


def _vmem_bytes(tile_b, D, x_itemsize):
    """Rough per-step VMEM estimate for the tile-size guard."""
    v = 2 * tile_b * D * x_itemsize                 # x tile, double-buffered
    v += 2 * 2 * (D * H1 + H1 * H2)                 # bf16 w1/w2, double-buffered
    v += 2 * 4 * (H1 + H2 + H2)                     # b1/b2/w3 rows (f32)
    v += 2 * 4 * 8 * tile_b                         # (1,1,tile_b) out block (8-sublane pad)
    v += 4 * tile_b * (H1 + H2) + 2 * tile_b * H1   # h1/h2 f32 temps + bf16 h1 copy
    return v


def _pick_tile_b(B, D, x_itemsize):
    """Largest MXU-aligned batch tile that fits VMEM; prefer an even step count."""
    candidates = [t for t in (1024, 512, 256, 128)
                  if _vmem_bytes(t, D, x_itemsize) <= _VMEM_BUDGET]
    if not candidates:
        candidates = [128]
    if B <= candidates[-1]:
        return candidates[-1]                        # tiny batch: one small tile
    # Prefer the largest tile giving an even number (>= 2) of grid steps so
    # v7x's two TensorCores split the "parallel" axis evenly.
    for t in candidates:
        n = pl.cdiv(B, t)
        if n >= 2 and n % 2 == 0:
            return t
    # Otherwise the largest tile that still gives >= 2 steps.
    for t in candidates:
        if pl.cdiv(B, t) >= 2:
            return t
    return candidates[-1]


def prepare_params(params):
    """One-time parameter prep: bf16 matmul weights, lane-dense w3, SMEM scalar b3."""
    w1, b1, w2, b2, w3, b3 = params
    return (w1.astype(jnp.bfloat16),
            b1.reshape(1, H1).astype(jnp.float32),
            w2.astype(jnp.bfloat16),
            b2.reshape(1, H2).astype(jnp.float32),
            w3.reshape(1, H2).astype(jnp.float32),
            b3.reshape(1).astype(jnp.float32))


def mlp_forward(x, prepared_params, *, tile_b=None):
    """Full MLP forward pass in one Pallas kernel, tiled over the (padded) batch."""
    w1_bf, b1, w2_bf, b2, w3_row, b3_s = prepared_params
    B, D = x.shape

    if tile_b is None:
        tile_b = _pick_tile_b(B, D, x.dtype.itemsize)

    n_tiles = pl.cdiv(B, tile_b)
    B_pad = n_tiles * tile_b
    if B_pad != B:
        x = jnp.pad(x, ((0, B_pad - B), (0, 0)))

    flops = 2 * B_pad * (D * H1 + H1 * H2 + H2)
    bytes_accessed = (x.size * x.dtype.itemsize
                      + w1_bf.size * 2 + w2_bf.size * 2
                      + (b1.size + b2.size + w3_row.size + b3_s.size) * 4
                      + B_pad * 4)

    out = pl.pallas_call(
        mlp_kernel,
        out_shape=jax.ShapeDtypeStruct((n_tiles, 1, tile_b), jnp.float32),
        grid_spec=pltpu.PrefetchScalarGridSpec(
            num_scalar_prefetch=0,
            grid=(n_tiles,),
            in_specs=[
                pl.BlockSpec((tile_b, D), lambda i: (i, 0)),   # x tile
                pl.BlockSpec((D, H1), lambda i: (0, 0)),       # w1 (resident, bf16)
                pl.BlockSpec((1, H1), lambda i: (0, 0)),       # b1 (f32)
                pl.BlockSpec((H1, H2), lambda i: (0, 0)),      # w2 (resident, bf16)
                pl.BlockSpec((1, H2), lambda i: (0, 0)),       # b2 (f32)
                pl.BlockSpec((1, H2), lambda i: (0, 0)),       # w3 lane-dense (f32)
                pl.BlockSpec(memory_space=pltpu.MemorySpace.SMEM),  # b3 scalar
            ],
            out_specs=pl.BlockSpec((1, 1, tile_b), lambda i: (i, 0, 0)),
        ),
        compiler_params=pltpu.CompilerParams(
            dimension_semantics=("parallel",),
        ),
        cost_estimate=pl.CostEstimate(
            flops=flops, transcendentals=B_pad, bytes_accessed=bytes_accessed),
    )(x, w1_bf, b1, w2_bf, b2, w3_row, b3_s)

    # (n_tiles, 1, tile_b) -> (B, 1), dropping the pad rows.
    return out.reshape(-1)[:B, None]


def init_params(key, input_size):
    """Deterministic parameter init (PyTorch-style uniform fan-in bounds)."""
    k1, k2, k3, k4, k5, k6 = jax.random.split(key, 6)

    def u(k, shape, fan_in):
        bound = 1.0 / jnp.sqrt(fan_in)
        return jax.random.uniform(k, shape, jnp.float32, -bound, bound)

    w1 = u(k1, (input_size, H1), input_size)
    b1 = u(k2, (1, H1), input_size)
    w2 = u(k3, (H1, H2), H1)
    b2 = u(k4, (1, H2), H1)
    w3 = u(k5, (H2, 1), H2)
    b3 = u(k6, (1, 1), H2)
    return (w1, b1, w2, b2, w3, b3)


def mlp_reference(x, params):
    w1, b1, w2, b2, w3, b3 = params
    h1 = jnp.maximum(x @ w1 + b1, 0.0)
    h2 = jnp.maximum(h1 @ w2 + b2, 0.0)
    return jax.nn.sigmoid(h2 @ w3 + b3)


if __name__ == "__main__":
    key = jax.random.PRNGKey(0)
    kx, kp = jax.random.split(key)

    # Small demo shapes (kernel pads the batch up to the MXU-aligned tile).
    batch = 8
    input_size = 32
    x = jax.random.normal(kx, (batch, input_size), jnp.float32)
    params = init_params(kp, input_size)
    prepared = prepare_params(params)   # one-time bf16 cast / reshape

    out = mlp_forward(x, prepared)
    jax.block_until_ready(out)
    ref = mlp_reference(x, params)
    assert out.shape == (batch, 1)
    # bf16 matmul operands with f32 accumulation -> widened tolerance vs f32 ref.
    assert jnp.allclose(out, ref, atol=2e-2, rtol=2e-2), float(
        jnp.max(jnp.abs(out - ref)))

    # Exercise the multi-tile (even step count) + remainder-padding path as well.
    batch2 = 300
    x2 = jax.random.normal(kx, (batch2, input_size), jnp.float32)
    out2 = mlp_forward(x2, prepared)
    jax.block_until_ready(out2)
    ref2 = mlp_reference(x2, params)
    assert out2.shape == (batch2, 1)
    assert jnp.allclose(out2, ref2, atol=2e-2, rtol=2e-2), float(
        jnp.max(jnp.abs(out2 - ref2)))

    print("KERNEL_OK")
</pallas_src>

<mosaic_0001>
module attributes {stable_mosaic.version = 11 : i64} {
  func.func @mlp_kernel(%arg0: i32, %arg1: memref<128x32xf32, #tpu.memory_space<vmem>>, %arg2: memref<32x512xbf16, #tpu.memory_space<vmem>>, %arg3: memref<1x512xf32, #tpu.memory_space<vmem>>, %arg4: memref<512x256xbf16, #tpu.memory_space<vmem>>, %arg5: memref<1x256xf32, #tpu.memory_space<vmem>>, %arg6: memref<1x256xf32, #tpu.memory_space<vmem>>, %arg7: memref<1xf32, #tpu.memory_space<smem>>, %arg8: memref<1x1x128xf32, #tpu.memory_space<vmem>>) attributes {dimension_semantics = [#tpu.dimension_semantics<parallel>], iteration_bounds = array<i64: 1>, scalar_prefetch = 0 : i64, scratch_operands = 0 : i64, tpu.core_type = #tpu.core_type<tc>, window_params = [{transform_indices = @transform_0, window_bounds = array<i64: 128, 32>}, {pipeline_mode = #tpu.pipeline_mode<synchronous>, transform_indices = @transform_1, window_bounds = array<i64: 32, 512>}, {pipeline_mode = #tpu.pipeline_mode<synchronous>, transform_indices = @transform_2, window_bounds = array<i64: 1, 512>}, {pipeline_mode = #tpu.pipeline_mode<synchronous>, transform_indices = @transform_3, window_bounds = array<i64: 512, 256>}, {pipeline_mode = #tpu.pipeline_mode<synchronous>, transform_indices = @transform_4, window_bounds = array<i64: 1, 256>}, {pipeline_mode = #tpu.pipeline_mode<synchronous>, transform_indices = @transform_5, window_bounds = array<i64: 1, 256>}, {transform_indices = @transform_6, window_bounds = array<i64: 1>}, {transform_indices = @transform_7, window_bounds = array<i64: 1, 1, 128>}]} {
    %c0 = arith.constant 0 : index
    %c0_0 = arith.constant 0 : index
    %0 = vector.load %arg1[%c0, %c0_0] : memref<128x32xf32, #tpu.memory_space<vmem>>, vector<128x32xf32>
    %1 = arith.truncf %0 : vector<128x32xf32> to vector<128x32xbf16>
    %c0_1 = arith.constant 0 : index
    %c0_2 = arith.constant 0 : index
    %2 = vector.load %arg2[%c0_1, %c0_2] : memref<32x512xbf16, #tpu.memory_space<vmem>>, vector<32x512xbf16>
    %cst = arith.constant dense<0.000000e+00> : vector<128x512xf32>
    %3 = tpu.matmul %1, %2, %cst {dimension_numbers = #tpu.dot_dimension_numbers<[1], [0], [0], [1], [0, 0, 1, 1], [], []>} : vector<128x32xbf16>, vector<32x512xbf16>, vector<128x512xf32> -> vector<128x512xf32>
    %c0_3 = arith.constant 0 : index
    %c0_4 = arith.constant 0 : index
    %4 = vector.load %arg3[%c0_3, %c0_4] : memref<1x512xf32, #tpu.memory_space<vmem>>, vector<1x512xf32>
    %5 = vector.broadcast %4 : vector<1x512xf32> to vector<128x512xf32>
    %6 = arith.addf %3, %5 : vector<128x512xf32>
    %cst_5 = arith.constant 0.000000e+00 : f32
    %7 = vector.broadcast %cst_5 : f32 to vector<128x512xf32>
    %8 = arith.maximumf %6, %7 : vector<128x512xf32>
    %9 = arith.truncf %8 : vector<128x512xf32> to vector<128x512xbf16>
    %c0_6 = arith.constant 0 : index
    %c0_7 = arith.constant 0 : index
    %10 = vector.load %arg4[%c0_6, %c0_7] : memref<512x256xbf16, #tpu.memory_space<vmem>>, vector<512x256xbf16>
    %cst_8 = arith.constant dense<0.000000e+00> : vector<128x256xf32>
    %11 = tpu.matmul %9, %10, %cst_8 {dimension_numbers = #tpu.dot_dimension_numbers<[1], [0], [0], [1], [0, 0, 1, 1], [], []>} : vector<128x512xbf16>, vector<512x256xbf16>, vector<128x256xf32> -> vector<128x256xf32>
    %c0_9 = arith.constant 0 : index
    %c0_10 = arith.constant 0 : index
    %12 = vector.load %arg5[%c0_9, %c0_10] : memref<1x256xf32, #tpu.memory_space<vmem>>, vector<1x256xf32>
    %13 = vector.broadcast %12 : vector<1x256xf32> to vector<128x256xf32>
    %14 = arith.addf %11, %13 : vector<128x256xf32>
    %cst_11 = arith.constant 0.000000e+00 : f32
    %15 = vector.broadcast %cst_11 : f32 to vector<128x256xf32>
    %16 = arith.maximumf %14, %15 : vector<128x256xf32>
    %c0_12 = arith.constant 0 : index
    %c0_13 = arith.constant 0 : index
    %17 = vector.load %arg6[%c0_12, %c0_13] : memref<1x256xf32, #tpu.memory_space<vmem>>, vector<1x256xf32>
    %18 = vector.broadcast %17 : vector<1x256xf32> to vector<128x256xf32>
    %19 = arith.mulf %16, %18 : vector<128x256xf32>
    %cst_14 = arith.constant dense<0.000000e+00> : vector<128xf32>
    %20 = vector.multi_reduction <add>, %19, %cst_14 [1] : vector<128x256xf32> to vector<128xf32>
    %21 = vector.shape_cast %20 : vector<128xf32> to vector<1x128xf32>
    %c0_15 = arith.constant 0 : index
    %22 = memref.load %arg7[%c0_15] : memref<1xf32, #tpu.memory_space<smem>>
    %23 = vector.broadcast %22 : f32 to vector<1x128xf32>
    %24 = arith.addf %21, %23 : vector<1x128xf32>
    %25 = arith.negf %24 : vector<1x128xf32>
    %26 = math.exp %25 : vector<1x128xf32>
    %cst_16 = arith.constant 1.000000e+00 : f32
    %27 = vector.broadcast %cst_16 : f32 to vector<1x128xf32>
    %28 = arith.addf %27, %26 : vector<1x128xf32>
    %29 = arith.divf %27, %28 : vector<1x128xf32>
    %30 = vector.shape_cast %29 : vector<1x128xf32> to vector<1x1x128xf32>
    %c0_17 = arith.constant 0 : index
    %c0_18 = arith.constant 0 : index
    %c0_19 = arith.constant 0 : index
    %31 = vector.load %arg8[%c0_17, %c0_18, %c0_19] : memref<1x1x128xf32, #tpu.memory_space<vmem>>, vector<1x1x128xf32>
    tpu.vector_store %arg8[%c0_17, %c0_18, %c0_19], %30 {strides = array<i32>} : memref<1x1x128xf32, #tpu.memory_space<vmem>>, vector<1x1x128xf32>,
    return
  }
  func.func @transform_0(%arg0: i32) -> (i32, i32) {
    %c0_i32 = arith.constant 0 : i32
    %c0_i32_0 = arith.constant 0 : i32
    return %arg0, %c0_i32 : i32, i32
  }
  func.func @transform_1(%arg0: i32) -> (i32, i32) {
    %c0_i32 = arith.constant 0 : i32
    %c0_i32_0 = arith.constant 0 : i32
    %c0_i32_1 = arith.constant 0 : i32
    return %c0_i32, %c0_i32_0 : i32, i32
  }
  func.func @transform_2(%arg0: i32) -> (i32, i32) {
    %c0_i32 = arith.constant 0 : i32
    %c0_i32_0 = arith.constant 0 : i32
    %c0_i32_1 = arith.constant 0 : i32
    return %c0_i32, %c0_i32_0 : i32, i32
  }
  func.func @transform_3(%arg0: i32) -> (i32, i32) {
    %c0_i32 = arith.constant 0 : i32
    %c0_i32_0 = arith.constant 0 : i32
    %c0_i32_1 = arith.constant 0 : i32
    return %c0_i32, %c0_i32_0 : i32, i32
  }
  func.func @transform_4(%arg0: i32) -> (i32, i32) {
    %c0_i32 = arith.constant 0 : i32
    %c0_i32_0 = arith.constant 0 : i32
    %c0_i32_1 = arith.constant 0 : i32
    return %c0_i32, %c0_i32_0 : i32, i32
  }
  func.func @transform_5(%arg0: i32) -> (i32, i32) {
    %c0_i32 = arith.constant 0 : i32
    %c0_i32_0 = arith.constant 0 : i32
    %c0_i32_1 = arith.constant 0 : i32
    return %c0_i32, %c0_i32_0 : i32, i32
  }
  func.func @transform_6(%arg0: i32) -> i32 {
    %c0_i32 = arith.constant 0 : i32
    %c0_i32_0 = arith.constant 0 : i32
    return %c0_i32 : i32
  }
  func.func @transform_7(%arg0: i32) -> (i32, i32, i32) {
    %c0_i32 = arith.constant 0 : i32
    %c0_i32_0 = arith.constant 0 : i32
    %c0_i32_1 = arith.constant 0 : i32
    return %arg0, %c0_i32, %c0_i32_0 : i32, i32, i32
  }
}

</mosaic_0001>

<bundles_post_ra>
// kernel: tpu_custom_call.1
= control target key start
LH: loop header
LB: loop body
LE: loop exit
PB: predicated region body
PF: predicated region fallthrough
CT: control target
= control target key end

     0   :  { %13 = vsyncpa [#allocation4], 0  ;;  %s3258_s0 = inlined_call_operand.vmem [shape: f32[128,32], index: 0, kind: input, shape index: {}]   ;;  %s3259_s1 = inlined_call_operand.vmem [shape: bf16[32,512], index: 1, kind: input, shape index: {}]   ;;  %s3260_s2 = inlined_call_operand.vmem [shape: f32[1,512], index: 2, kind: input, shape index: {}]   ;;  %s3261_s3 = inlined_call_operand.hbm [shape: bf16[512,256], index: 3, kind: input, shape index: {}]   ;;  %s3262_s4 = inlined_call_operand.vmem [shape: f32[1,256], index: 4, kind: input, shape index: {}]   ;;  %s3263_s5 = inlined_call_operand.vmem [shape: f32[1,256], index: 5, kind: input, shape index: {}]   ;;  %s3264_s6 = inlined_call_operand.<no memory space> [shape: f32[1], index: 6, kind: input, shape index: {}]   ;;  %s3265_s7 = inlined_call_operand.hbm [shape: f32[1,1,128], index: 7, kind: output, shape index: {}]  }
   0x1   :  { %14 = vsyncpa [#allocation5], 0  ;;  %s25_s26 = sshll.u32 %s3261_s3, 4  ;;  %s2292_s27 = smov [#allocation3]   ;;  %s26_s26 = int_to_ptr.hbm [resolvable:$true] %s25_s26 }
   0x2   :  { %s27_s28 = sshll.u32 %s2292_s27, 4  ;;  %s2293_s29 = smov 128   ;;  %s28_s28 = int_to_ptr.vmem [resolvable:$true] %s27_s28 }
   0x3   :  { %s2294_s30 = smov 8  }
   0x4   :  { %33 = dma.hbm_to_vmem [thread:$0]  %s26_s26, 8192, %s28_s28, [#allocation4], %s2293_s29, %s2293_s29, %s2294_s30  }
   0x5   :  { %2288 = dma.done.wait [#allocation4], 8192  }
   0x6   :  { %2289 = vsyncadd [#allocation4], 4294959104  ;;  %v1782_v0 = vld [vmem:[%s3259_s1 + $0x20] sm:$0xf]  ;;  %v2106_v1 = vld [vmem:[%s3259_s1 + $0x2c] sm:$0xf0] }
   0x7   :  { %v2104_v2 = vld [vmem:[%s3259_s1 + $0x24] sm:$0xf]  ;;  %v1783_v3 = vor.u32 %v2106_v1, %v1782_v0  ;;  %v1784_v4 = vld [vmem:[%s3259_s1 + $0x30] sm:$0xf0]  ;;  %v1790_v5 = vld [vmem:[%s3259_s1 + $0x28] sm:$0xf] }
   0x8   :  { %v2107_v6 = vld [vmem:[%s3259_s1 + $0x34] sm:$0xf0]  ;;  %v1787_v7 = vor.u32 %v2104_v2, %v1784_v4  ;;  %v2105_v9 = vld [vmem:[%s3259_s1 + $0x2c] sm:$0xf]  ;;  %v1792_v10 = vld [vmem:[%s3259_s1 + $0x38] sm:$0xf0] }
   0x9   :  { %v1791_v8 = vor.u32 %v2107_v6, %v1790_v5  ;;  %v1766_v11 = vld [vmem:[%s3259_s1] sm:$0xf]  ;;  %158 = vmatpush.bf16.msra.mxu0 %v1783_v3  ;;  %v1795_v12 = vor.u32 %v2105_v9, %v1792_v10  ;;  %v2102_v13 = vld [vmem:[%s3259_s1 + $0xc] sm:$0xf0]  ;;  %v2100_v14 = vld [vmem:[%s3259_s1 + $0x4] sm:$0xf] }
   0xa   :  { %v1768_v15 = vld [vmem:[%s3259_s1 + $0x10] sm:$0xf0]  ;;  %207 = vmatpush.bf16.msra.mxu1 %v1787_v7  ;;  %v1767_v16 = vor.u32 %v2102_v13, %v1766_v11  ;;  %v1774_v18 = vld [vmem:[%s3259_s1 + $0x8] sm:$0xf]  ;;  %v2103_v19 = vld [vmem:[%s3259_s1 + $0x14] sm:$0xf0] }
   0xb   :  { %256 = vmatpush.bf16.msra.mxu2 %v1791_v8  ;;  %v1771_v17 = vor.u32 %v2100_v14, %v1768_v15  ;;  %v2101_v20 = vld [vmem:[%s3259_s1 + $0xc] sm:$0xf]  ;;  %305 = vmatpush.bf16.msra.mxu3 %v1795_v12  ;;  %v1775_v21 = vor.u32 %v2103_v19, %v1774_v18  ;;  %v1776_v22 = vld [vmem:[%s3259_s1 + $0x18] sm:$0xf0]  ;;  %v45_v23 = vld [vmem:[%s3258_s0] sm:$0xff]  ;;  %vm127_vm0 = vcmask 261120  }
   0xc   :  { %v46_v24 = vld [vmem:[%s3258_s0 + $0x8] sm:$0xff]  ;;  %v1779_v25 = vor.u32 %v2101_v20, %v1776_v22  ;;  %v2014_v27 = vld [vmem:[#allocation3 + $0x170] sm:$0xf]  ;;  %v2155_v28 = vld [vmem:[#allocation3 + $0x174] sm:$0xf0]  ;;  %vm1687_vm8 = vcmask 130112  }
   0xd   :  { %v61_v26 = vpack.c.bf16 %v46_v24, %v45_v23  ;;  %159 = vmatpush.bf16.msra.mxu0 %v1767_v16  ;;  %v1886_v29 = vld [vmem:[#allocation3 + $0x70] sm:$0xf]  ;;  %v2123_v30 = vld [vmem:[#allocation3 + $0x74] sm:$0xf0]  ;;  %v2015_v31 = vor.u32 %v2155_v28, %v2014_v27  ;;  %v2006_v39 = vld [vmem:[#allocation3 + $0x160] sm:$0xf] }
   0xe   :  { %208 = vmatpush.bf16.msra.mxu1 %v1771_v17  ;;  %v1887_v32 = vor.u32 %v2123_v30, %v1886_v29  ;;  %v2078_v33 = vld [vmem:[#allocation3 + $0x1f0] sm:$0xf]  ;;  %v2171_v34 = vld [vmem:[#allocation3 + $0x1f4] sm:$0xf0]  ;;  %v2153_v40 = vld [vmem:[#allocation3 + $0x164] sm:$0xf0] }
   0xf   :  { %257 = vmatpush.bf16.msra.mxu2 %v1775_v21  ;;  %v1950_v35 = vld [vmem:[#allocation3 + $0xf0] sm:$0xf]  ;;  %306 = vmatpush.bf16.msra.mxu3 %v1779_v25  ;;  %v2079_v36 = vor.u32 %v2171_v34, %v2078_v33  ;;  %v2139_v37 = vld [vmem:[#allocation3 + $0xf4] sm:$0xf0]  ;;  %v1878_v41 = vld [vmem:[#allocation3 + $0x60] sm:$0xf]  ;;  %v2007_v42 = vor.u32 %v2153_v40, %v2006_v39 }
  0x10   :  { %1796 = vmatmul.msk.bf16.vlgmr.msra.gmra.mxu0 %vm127_vm0, %v61_v26  ;;  %v1951_v38 = vor.u32 %v2139_v37, %v1950_v35  ;;  %v2121_v43 = vld [vmem:[#allocation3 + $0x64] sm:$0xf0]  ;;  %v2070_v44 = vld [vmem:[#allocation3 + $0x1e0] sm:$0xf]  ;;  %v47_v51 = vld [vmem:[%s3258_s0 + $0x10] sm:$0xff]  ;;  %vm1691_vm12 = vcmask 195712  }
  0x11   :  { %1804 = vmatmul.msk.bf16.vlgmr.msra.gmra.mxu1 %vm127_vm0, %v61_v26  ;;  %834 = vmatpush.bf16.msrb.mxu0 %v1887_v32  ;;  %v2169_v45 = vld [vmem:[#allocation3 + $0x1e4] sm:$0xf0]  ;;  %v1879_v46 = vor.u32 %v2121_v43, %v1878_v41  ;;  %v1942_v48 = vld [vmem:[#allocation3 + $0xe0] sm:$0xf]  ;;  %v48_v52 = vld [vmem:[%s3258_s0 + $0x18] sm:$0xff]  ;;  %s1754_s28 = sshll.u32 %s3265_s7, 4  ;;  %s1755_s28 = int_to_ptr.hbm [resolvable:$true] %s1754_s28 }
  0x12   :  { %1812 = vmatmul.msk.bf16.vlgmr.msra.gmra.mxu2 %vm127_vm0, %v61_v26  ;;  %1820 = vmatmul.msk.bf16.vlgmr.msra.gmra.mxu3 %vm127_vm0, %v61_v26  ;;  %v2071_v47 = vor.u32 %v2169_v45, %v2070_v44  ;;  %v2137_v49 = vld [vmem:[#allocation3 + $0xe4] sm:$0xf0]  ;;  %v62_v53 = vpack.c.bf16 %v48_v52, %v47_v51  ;;  %v1998_v54 = vld [vmem:[#allocation3 + $0x150] sm:$0xf]  ;;  %v2151_v55 = vld [vmem:[#allocation3 + $0x154] sm:$0xf0] }
  0x13   :  { %932 = vmatpush.bf16.msrb.mxu2 %v2015_v31  ;;  %981 = vmatpush.bf16.msrb.mxu3 %v2079_v36  ;;  %v1943_v50 = vor.u32 %v2137_v49, %v1942_v48  ;;  %v1870_v56 = vld [vmem:[#allocation3 + $0x50] sm:$0xf]  ;;  %v1999_v57 = vor.u32 %v2151_v55, %v1998_v54  ;;  %v2119_v58 = vld [vmem:[#allocation3 + $0x54] sm:$0xf0]  ;;  %v49_v2 = vld [vmem:[%s3258_s0 + $0x20] sm:$0xff] }
  0x14   :  { %883 = vmatpush.bf16.msrb.mxu1 %v1951_v38  ;;  %v2062_v59 = vld [vmem:[#allocation3 + $0x1d0] sm:$0xf]  ;;  %v2167_v60 = vld [vmem:[#allocation3 + $0x1d4] sm:$0xf0]  ;;  %v1871_v61 = vor.u32 %v2119_v58, %v1870_v56  ;;  %v50_v3 = vld [vmem:[%s3258_s0 + $0x28] sm:$0xff] }
  0x15   :  { %835 = vmatpush.bf16.msrb.mxu0 %v1879_v46  ;;  %v2063_v62 = vor.u32 %v2167_v60, %v2062_v59  ;;  %v1934_v63 = vld [vmem:[#allocation3 + $0xd0] sm:$0xf]  ;;  %v2135_v0 = vld [vmem:[#allocation3 + $0xd4] sm:$0xf0]  ;;  %v63_v4 = vpack.c.bf16 %v50_v3, %v49_v2  ;;  %v1990_v5 = vld [vmem:[#allocation3 + $0x140] sm:$0xf] }
  0x16   :  { %v1935_v1 = vor.u32 %v2135_v0, %v1934_v63  ;;  %v2149_v6 = vld [vmem:[#allocation3 + $0x144] sm:$0xf0]  ;;  %v1862_v7 = vld [vmem:[#allocation3 + $0x40] sm:$0xf]  ;;  %v51_v17 = vld [vmem:[%s3258_s0 + $0x30] sm:$0xff] }
  0x17   :  { %933 = vmatpush.bf16.msrb.mxu2 %v2007_v42  ;;  %982 = vmatpush.bf16.msrb.mxu3 %v2071_v47  ;;  %v1991_v8 = vor.u32 %v2149_v6, %v1990_v5  ;;  %v2117_v9 = vld [vmem:[#allocation3 + $0x44] sm:$0xf0]  ;;  %v2054_v10 = vld [vmem:[#allocation3 + $0x1c0] sm:$0xf]  ;;  %v52_v18 = vld [vmem:[%s3258_s0 + $0x38] sm:$0xff] }
  0x18   :  { %884 = vmatpush.bf16.msrb.mxu1 %v1943_v50  ;;  %v2165_v11 = vld [vmem:[#allocation3 + $0x1c4] sm:$0xf0]  ;;  %v1863_v12 = vor.u32 %v2117_v9, %v1862_v7  ;;  %v1926_v14 = vld [vmem:[#allocation3 + $0xc0] sm:$0xf]  ;;  %v64_v19 = vpack.c.bf16 %v52_v18, %v51_v17  ;;  %v1982_v20 = vld [vmem:[#allocation3 + $0x130] sm:$0xf] }
  0x19   :  { %836 = vmatpush.bf16.msrb.mxu0 %v1871_v61  ;;  %v2055_v13 = vor.u32 %v2165_v11, %v2054_v10  ;;  %v2133_v15 = vld [vmem:[#allocation3 + $0xc4] sm:$0xf0]  ;;  %v2147_v21 = vld [vmem:[#allocation3 + $0x134] sm:$0xf0]  ;;  %v1854_v22 = vld [vmem:[#allocation3 + $0x30] sm:$0xf] }
  0x1a   :  { %v1927_v16 = vor.u32 %v2133_v15, %v1926_v14  ;;  %v1983_v23 = vor.u32 %v2147_v21, %v1982_v20  ;;  %v2115_v24 = vld [vmem:[#allocation3 + $0x34] sm:$0xf0]  ;;  %v2046_v25 = vld [vmem:[#allocation3 + $0x1b0] sm:$0xf]  ;;  %v53_v32 = vld [vmem:[%s3258_s0 + $0x40] sm:$0xff] }
  0x1b   :  { %934 = vmatpush.bf16.msrb.mxu2 %v1999_v57  ;;  %983 = vmatpush.bf16.msrb.mxu3 %v2063_v62  ;;  %v2163_v26 = vld [vmem:[#allocation3 + $0x1b4] sm:$0xf0]  ;;  %v1855_v27 = vor.u32 %v2115_v24, %v1854_v22  ;;  %v1918_v29 = vld [vmem:[#allocation3 + $0xb0] sm:$0xf]  ;;  %v54_v33 = vld [vmem:[%s3258_s0 + $0x48] sm:$0xff] }
  0x1c   :  { %885 = vmatpush.bf16.msrb.mxu1 %v1935_v1  ;;  %v2047_v28 = vor.u32 %v2163_v26, %v2046_v25  ;;  %v2131_v30 = vld [vmem:[#allocation3 + $0xb4] sm:$0xf0]  ;;  %v65_v34 = vpack.c.bf16 %v54_v33, %v53_v32  ;;  %v1974_v35 = vld [vmem:[#allocation3 + $0x120] sm:$0xf]  ;;  %v2145_v36 = vld [vmem:[#allocation3 + $0x124] sm:$0xf0] }
  0x1d   :  { %837 = vmatpush.bf16.msrb.mxu0 %v1863_v12  ;;  %v1919_v31 = vor.u32 %v2131_v30, %v1918_v29  ;;  %v1846_v37 = vld [vmem:[#allocation3 + $0x20] sm:$0xf]  ;;  %v1975_v38 = vor.u32 %v2145_v36, %v1974_v35  ;;  %v2113_v39 = vld [vmem:[#allocation3 + $0x24] sm:$0xf0]  ;;  %v55_v47 = vld [vmem:[%s3258_s0 + $0x50] sm:$0xff] }
  0x1e   :  { %v2038_v40 = vld [vmem:[#allocation3 + $0x1a0] sm:$0xf]  ;;  %v2161_v41 = vld [vmem:[#allocation3 + $0x1a4] sm:$0xf0]  ;;  %v1847_v42 = vor.u32 %v2113_v39, %v1846_v37  ;;  %v56_v48 = vld [vmem:[%s3258_s0 + $0x58] sm:$0xff] }
  0x1f   :  { %935 = vmatpush.bf16.msrb.mxu2 %v1991_v8  ;;  %984 = vmatpush.bf16.msrb.mxu3 %v2055_v13  ;;  %v2039_v43 = vor.u32 %v2161_v41, %v2038_v40  ;;  %v1910_v44 = vld [vmem:[#allocation3 + $0xa0] sm:$0xf]  ;;  %v2129_v45 = vld [vmem:[#allocation3 + $0xa4] sm:$0xf0]  ;;  %v66_v49 = vpack.c.bf16 %v56_v48, %v55_v47  ;;  %v1966_v50 = vld [vmem:[#allocation3 + $0x110] sm:$0xf] }
  0x20   :  { %1797 = vmatmul.msk.bf16.gmra.mxu0 %vm127_vm0, %v62_v53  ;;  %886 = vmatpush.bf16.msrb.mxu1 %v1927_v16  ;;  %v1911_v46 = vor.u32 %v2129_v45, %v1910_v44  ;;  %v2143_v51 = vld [vmem:[#allocation3 + $0x114] sm:$0xf0]  ;;  %v1838_v52 = vld [vmem:[#allocation3 + $0x10] sm:$0xf]  ;;  %v57_v62 = vld [vmem:[%s3258_s0 + $0x60] sm:$0xff] }
  0x21   :  { %1805 = vmatmul.msk.bf16.gmra.mxu1 %vm127_vm0, %v62_v53  ;;  %838 = vmatpush.bf16.msrb.mxu0 %v1855_v27  ;;  %v2111_v54 = vld [vmem:[#allocation3 + $0x14] sm:$0xf0]  ;;  %v2030_v55 = vld [vmem:[#allocation3 + $0x190] sm:$0xf]  ;;  %v58_v63 = vld [vmem:[%s3258_s0 + $0x68] sm:$0xff] }
  0x22   :  { %1813 = vmatmul.msk.bf16.gmra.mxu2 %vm127_vm0, %v62_v53  ;;  %1821 = vmatmul.msk.bf16.gmra.mxu3 %vm127_vm0, %v62_v53  ;;  %v1967_v53 = vor.u32 %v2143_v51, %v1966_v50  ;;  %v2159_v56 = vld [vmem:[#allocation3 + $0x194] sm:$0xf0]  ;;  %v1839_v57 = vor.u32 %v2111_v54, %v1838_v52  ;;  %v1902_v59 = vld [vmem:[#allocation3 + $0x90] sm:$0xf]  ;;  %v67_v0 = vpack.c.bf16 %v58_v63, %v57_v62  ;;  %v1958_v1 = vld [vmem:[#allocation3 + $0x100] sm:$0xf] }
  0x23   :  { %936 = vmatpush.bf16.msrb.mxu2 %v1983_v23  ;;  %985 = vmatpush.bf16.msrb.mxu3 %v2047_v28  ;;  %v2031_v58 = vor.u32 %v2159_v56, %v2030_v55  ;;  %v2127_v60 = vld [vmem:[#allocation3 + $0x94] sm:$0xf0]  ;;  %v2141_v2 = vld [vmem:[#allocation3 + $0x104] sm:$0xf0]  ;;  %v1830_v6 = vld [vmem:[#allocation3] sm:$0xf] }
  0x24   :  { %887 = vmatpush.bf16.msrb.mxu1 %v1919_v31  ;;  %v1903_v61 = vor.u32 %v2127_v60, %v1902_v59  ;;  %v1959_v3 = vor.u32 %v2141_v2, %v1958_v1  ;;  %v60_v5 = vld [vmem:[%s3258_s0 + $0x78] sm:$0xff]  ;;  %v2109_v7 = vld [vmem:[#allocation3 + $0x4] sm:$0xf0]  ;;  %v2022_v8 = vld [vmem:[#allocation3 + $0x180] sm:$0xf] }
  0x25   :  { %839 = vmatpush.bf16.msrb.mxu0 %v1847_v42  ;;  %v1831_v9 = vor.u32 %v2109_v7, %v1830_v6  ;;  %v2157_v10 = vld [vmem:[#allocation3 + $0x184] sm:$0xf0]  ;;  %v1894_v11 = vld [vmem:[#allocation3 + $0x80] sm:$0xf]  ;;  %v2154_v16 = vld [vmem:[#allocation3 + $0x174] sm:$0xf] }
  0x26   :  { %v2125_v12 = vld [vmem:[#allocation3 + $0x84] sm:$0xf0]  ;;  %v2023_v13 = vor.u32 %v2157_v10, %v2022_v8  ;;  %v2016_v17 = vld [vmem:[#allocation3 + $0x178] sm:$0xf0]  ;;  %v2170_v21 = vld [vmem:[#allocation3 + $0x1f4] sm:$0xf] }
  0x27   :  { %937 = vmatpush.bf16.msrb.mxu2 %v1975_v38  ;;  %986 = vmatpush.bf16.msrb.mxu3 %v2039_v43  ;;  %v1895_v14 = vor.u32 %v2125_v12, %v1894_v11  ;;  %v2019_v18 = vor.u32 %v2154_v16, %v2016_v17  ;;  %v1888_v20 = vld [vmem:[#allocation3 + $0x78] sm:$0xf0]  ;;  %v2138_v24 = vld [vmem:[#allocation3 + $0xf4] sm:$0xf]  ;;  %v77_v28 = vld [vmem:[%s3260_s2] sm:$0xf] }
  0x28   :  { %888 = vmatpush.bf16.msrb.mxu1 %v1911_v46  ;;  %v2080_v23 = vld [vmem:[#allocation3 + $0x1f8] sm:$0xf0]  ;;  %v2470_v30 = vperm.slane %v77_v28, 0  ;;  %v2472_v32 = vperm.slane %v77_v28, 1  ;;  %v2152_v36 = vld [vmem:[#allocation3 + $0x164] sm:$0xf] }
  0x29   :  { %840 = vmatpush.bf16.msrb.mxu0 %v1839_v57  ;;  %v1952_v25 = vld [vmem:[#allocation3 + $0xf8] sm:$0xf0]  ;;  %v2083_v26 = vor.u32 %v2170_v21, %v2080_v23  ;;  %v2008_v37 = vld [vmem:[#allocation3 + $0x168] sm:$0xf0]  ;;  %v2477_v45 = vperm.slane %v77_v28, 2  ;;  %v2480_v47 = vperm.slane %v77_v28, 3 }
  0x2a   :  { %v1955_v27 = vor.u32 %v2138_v24, %v1952_v25  ;;  %v2011_v40 = vor.u32 %v2152_v36, %v2008_v37  ;;  %v1880_v50 = vld [vmem:[#allocation3 + $0x68] sm:$0xf0]  ;;  %v2136_v57 = vld [vmem:[#allocation3 + $0xe4] sm:$0xf]  ;;  %v2118_v25 = vld [vmem:[#allocation3 + $0x54] sm:$0xf] }
  0x2b   :  { %938 = vmatpush.bf16.msrb.mxu2 %v1967_v53  ;;  %987 = vmatpush.bf16.msrb.mxu3 %v2031_v58  ;;  %v2168_v53 = vld [vmem:[#allocation3 + $0x1e4] sm:$0xf]  ;;  %v2072_v54 = vld [vmem:[#allocation3 + $0x1e8] sm:$0xf0]  ;;  %v1936_v36 = vld [vmem:[#allocation3 + $0xd8] sm:$0xf0] }
  0x2c   :  { %889 = vmatpush.bf16.msrb.mxu1 %v1903_v61  ;;  %v2075_v56 = vor.u32 %v2168_v53, %v2072_v54  ;;  %v1944_v58 = vld [vmem:[#allocation3 + $0xe8] sm:$0xf0] }
  0x2d   :  { %841 = vmatpush.bf16.msrb.mxu0 %v1831_v9  ;;  %v1947_v61 = vor.u32 %v2136_v57, %v1944_v58 }
  0x2f   :  { %939 = vmatpush.bf16.msrb.mxu2 %v1959_v3  ;;  %988 = vmatpush.bf16.msrb.mxu3 %v2023_v13 }
  0x30   :  { %1798 = vmatmul.msk.bf16.gmra.mxu0 %vm127_vm0, %v63_v4  ;;  %890 = vmatpush.bf16.msrb.mxu1 %v1895_v14  ;;  %v2150_v14 = vld [vmem:[#allocation3 + $0x154] sm:$0xf] }
  0x31   :  { %1806 = vmatmul.msk.bf16.gmra.mxu1 %vm127_vm0, %v63_v4 }
  0x32   :  { %1814 = vmatmul.msk.bf16.gmra.mxu2 %vm127_vm0, %v63_v4  ;;  %1822 = vmatmul.msk.bf16.gmra.mxu3 %vm127_vm0, %v63_v4  ;;  %v59_v4 = vld [vmem:[%s3258_s0 + $0x70] sm:$0xff] }
  0x33   :  { %v68_v15 = vpack.c.bf16 %v60_v5, %v59_v4  ;;  %1128 = vmatpush.bf16.msra.mxu2 %v2019_v18  ;;  %1177 = vmatpush.bf16.msra.mxu3 %v2083_v26  ;;  %v1872_v26 = vld [vmem:[#allocation3 + $0x58] sm:$0xf0] }
  0x34   :  { %1079 = vmatpush.bf16.msra.mxu1 %v1955_v27  ;;  %v1875_v28 = vor.u32 %v2118_v25, %v1872_v26 }
  0x37   :  { %1129 = vmatpush.bf16.msra.mxu2 %v2011_v40  ;;  %1178 = vmatpush.bf16.msra.mxu3 %v2075_v56 }
  0x38   :  { %1080 = vmatpush.bf16.msra.mxu1 %v1947_v61  ;;  %v1992_v61 = vld [vmem:[#allocation3 + $0x148] sm:$0xf0] }
  0x40   :  { %1799 = vmatmul.msk.bf16.gmra.mxu0 %vm127_vm0, %v64_v19 }
  0x41   :  { %1807 = vmatmul.msk.bf16.gmra.mxu1 %vm127_vm0, %v64_v19 }
  0x42   :  { %1815 = vmatmul.msk.bf16.gmra.mxu2 %vm127_vm0, %v64_v19  ;;  %1823 = vmatmul.msk.bf16.gmra.mxu3 %vm127_vm0, %v64_v19  ;;  %v2122_v19 = vld [vmem:[#allocation3 + $0x74] sm:$0xf] }
  0x43   :  { %v1891_v22 = vor.u32 %v2122_v19, %v1888_v20 }
  0x45   :  { %1030 = vmatpush.bf16.msra.mxu0 %v1891_v22 }
  0x50   :  { %1800 = vmatmul.msk.bf16.gmra.mxu0 %vm127_vm0, %v65_v34 }
  0x51   :  { %1808 = vmatmul.msk.bf16.gmra.mxu1 %vm127_vm0, %v65_v34 }
  0x52   :  { %1816 = vmatmul.msk.bf16.gmra.mxu2 %vm127_vm0, %v65_v34  ;;  %1824 = vmatmul.msk.bf16.gmra.mxu3 %vm127_vm0, %v65_v34 }
  0x60   :  { %1801 = vmatmul.msk.bf16.gmra.mxu0 %vm127_vm0, %v66_v49 }
  0x61   :  { %1809 = vmatmul.msk.bf16.gmra.mxu1 %vm127_vm0, %v66_v49 }
  0x62   :  { %1817 = vmatmul.msk.bf16.gmra.mxu2 %vm127_vm0, %v66_v49  ;;  %1825 = vmatmul.msk.bf16.gmra.mxu3 %vm127_vm0, %v66_v49  ;;  %v2120_v49 = vld [vmem:[#allocation3 + $0x64] sm:$0xf] }
  0x63   :  { %v1883_v52 = vor.u32 %v2120_v49, %v1880_v50 }
  0x65   :  { %1031 = vmatpush.bf16.msra.mxu0 %v1883_v52 }
  0x69   :  { %1032 = vmatpush.bf16.msra.mxu0 %v1875_v28 }
  0x70   :  { %1802 = vmatmul.msk.bf16.gmra.mxu0 %vm127_vm0, %v67_v0 }
  0x71   :  { %1810 = vmatmul.msk.bf16.gmra.mxu1 %vm127_vm0, %v67_v0 }
  0x72   :  { %1818 = vmatmul.msk.bf16.gmra.mxu2 %vm127_vm0, %v67_v0  ;;  %1826 = vmatmul.msk.bf16.gmra.mxu3 %vm127_vm0, %v67_v0 }
  0x80   :  { %1803 = vmatmul.msk.bf16.gmra.mxu0 %vm127_vm0, %v68_v15 }
  0x81   :  { %1811 = vmatmul.msk.bf16.gmra.mxu1 %vm127_vm0, %v68_v15 }
  0x82   :  { %1819 = vmatmul.msk.bf16.gmra.mxu2 %vm127_vm0, %v68_v15  ;;  %1827 = vmatmul.msk.bf16.gmra.mxu3 %vm127_vm0, %v68_v15  ;;  %v2000_v15 = vld [vmem:[#allocation3 + $0x158] sm:$0xf0] }
  0x83   :  { %v2003_v18 = vor.u32 %v2150_v14, %v2000_v15  ;;  %v2056_v14 = vld [vmem:[#allocation3 + $0x1c8] sm:$0xf0] }
  0x85   :  { %1130 = vmatpush.bf16.msra.mxu2 %v2003_v18  ;;  %v1928_v18 = vld [vmem:[#allocation3 + $0xc8] sm:$0xf0] }
  0x8d   :  { %v161_v29 = vpop.f32.mrf.mxu0 }
  0x8e   :  { %v210_v31 = vpop.f32.mrf.mxu1  ;;  %v162_v33 = vadd.f32 %v161_v29, %v2470_v30  ;;  %v2166_v29 = vld [vmem:[#allocation3 + $0x1d4] sm:$0xf] }
  0x8f   :  { %v211_v34 = vadd.f32 %v210_v31, %v2472_v32  ;;  %v2064_v31 = vld [vmem:[#allocation3 + $0x1d8] sm:$0xf0] }
  0x90   :  { %v348_v41 = vmax.f32 %v162_v33, 0.0 }
  0x91   :  { %v349_v44 = vmax.f32 %v211_v34, 0.0  ;;  %v2067_v34 = vor.u32 %v2166_v29, %v2064_v31 }
  0x93   :  { %1179 = vmatpush.bf16.msra.mxu3 %v2067_v34 }
  0x95   :  { %v259_v35 = vpop.f32.mrf.mxu2  ;;  %v308_v38 = vpop.f32.mrf.mxu3 }
  0x96   :  { %v163_v39 = vpop.f32.mrf.mxu0  ;;  %v212_v43 = vpop.f32.mrf.mxu1  ;;  %v260_v59 = vadd.f32 %v259_v35, %v2477_v45  ;;  %v309_v62 = vadd.f32 %v308_v38, %v2480_v47  ;;  %v2134_v35 = vld [vmem:[#allocation3 + $0xd4] sm:$0xf] }
  0x97   :  { %v164_v42 = vadd.f32 %v163_v39, %v2470_v30  ;;  %v213_v46 = vadd.f32 %v212_v43, %v2472_v32  ;;  %v1939_v39 = vor.u32 %v2134_v35, %v1936_v36 }
  0x98   :  { %v350_v5 = vmax.f32 %v260_v59, 0.0  ;;  %v351_v7 = vmax.f32 %v309_v62, 0.0  ;;  %v2148_v59 = vld [vmem:[#allocation3 + $0x144] sm:$0xf] }
  0x99   :  { %v352_v48 = vmax.f32 %v164_v42, 0.0  ;;  %v353_v51 = vmax.f32 %v213_v46, 0.0  ;;  %1081 = vmatpush.bf16.msra.mxu1 %v1939_v39 }
  0x9b   :  { %v2482_v55 = vpack.c.bf16 %v352_v48, %v348_v41  ;;  %v2485_v60 = vpack.c.bf16 %v353_v51, %v349_v44 }
  0x9d   :  { %v261_v63 = vpop.f32.mrf.mxu2  ;;  %842 = vmatmul.bf16.vlgmr.msrb.gmra.mxu0 %v2482_v55  ;;  %v310_v1 = vpop.f32.mrf.mxu3  ;;  %891 = vmatmul.bf16.vlgmr.msrb.gmra.mxu1 %v2485_v60 }
  0x9e   :  { %v262_v0 = vadd.f32 %v261_v63, %v2477_v45  ;;  %v166_v2 = vpop.f32.mrf.mxu0  ;;  %v311_v3 = vadd.f32 %v310_v1, %v2480_v47  ;;  %v215_v4 = vpop.f32.mrf.mxu1 }
  0x9f   :  { %v167_v10 = vadd.f32 %v166_v2, %v2470_v30  ;;  %v216_v12 = vadd.f32 %v215_v4, %v2472_v32 }
  0xa0   :  { %v354_v6 = vmax.f32 %v262_v0, 0.0  ;;  %v355_v8 = vmax.f32 %v311_v3, 0.0  ;;  %v1995_v0 = vor.u32 %v2148_v59, %v1992_v61  ;;  %v1856_v59 = vld [vmem:[#allocation3 + $0x38] sm:$0xf0] }
  0xa1   :  { %v356_v19 = vmax.f32 %v167_v10, 0.0  ;;  %v357_v22 = vmax.f32 %v216_v12, 0.0 }
  0xa2   :  { %v2492_v9 = vpack.c.bf16 %v354_v6, %v350_v5  ;;  %v2495_v11 = vpack.c.bf16 %v355_v8, %v351_v7  ;;  %1131 = vmatpush.bf16.msra.mxu2 %v1995_v0  ;;  %v2116_v7 = vld [vmem:[#allocation3 + $0x44] sm:$0xf]  ;;  %v1864_v8 = vld [vmem:[#allocation3 + $0x48] sm:$0xf0]  ;;  %v2048_v0 = vld [vmem:[#allocation3 + $0x1b8] sm:$0xf0] }
  0xa3   :  { %v1867_v12 = vor.u32 %v2116_v7, %v1864_v8 }
  0xa4   :  { %940 = vmatmul.bf16.vlgmr.msrb.gmra.mxu2 %v2492_v9  ;;  %989 = vmatmul.bf16.vlgmr.msrb.gmra.mxu3 %v2495_v11 }
  0xa5   :  { %v264_v13 = vpop.f32.mrf.mxu2  ;;  %v313_v16 = vpop.f32.mrf.mxu3  ;;  %1033 = vmatpush.bf16.msra.mxu0 %v1867_v12 }
  0xa6   :  { %v168_v17 = vpop.f32.mrf.mxu0  ;;  %v217_v21 = vpop.f32.mrf.mxu1  ;;  %v265_v37 = vadd.f32 %v264_v13, %v2477_v45  ;;  %v314_v40 = vadd.f32 %v313_v16, %v2480_v47  ;;  %v2164_v13 = vld [vmem:[#allocation3 + $0x1c4] sm:$0xf] }
  0xa7   :  { %v169_v20 = vadd.f32 %v168_v17, %v2470_v30  ;;  %v218_v23 = vadd.f32 %v217_v21, %v2472_v32  ;;  %v2059_v16 = vor.u32 %v2164_v13, %v2056_v14  ;;  %v2132_v17 = vld [vmem:[#allocation3 + $0xc4] sm:$0xf] }
  0xa8   :  { %v358_v49 = vmax.f32 %v265_v37, 0.0  ;;  %v359_v51 = vmax.f32 %v314_v40, 0.0  ;;  %v1931_v21 = vor.u32 %v2132_v17, %v1928_v18 }
  0xa9   :  { %v360_v24 = vmax.f32 %v169_v20, 0.0  ;;  %v361_v27 = vmax.f32 %v218_v23, 0.0  ;;  %1180 = vmatpush.bf16.msra.mxu3 %v2059_v16 }
  0xaa   :  { %1082 = vmatpush.bf16.msra.mxu1 %v1931_v21 }
  0xab   :  { %v2502_v33 = vpack.c.bf16 %v360_v24, %v356_v19  ;;  %v2505_v38 = vpack.c.bf16 %v361_v27, %v357_v22 }
  0xad   :  { %v266_v41 = vpop.f32.mrf.mxu2  ;;  %847 = vmatmul.bf16.gmra.mxu0 %v2502_v33  ;;  %v315_v43 = vpop.f32.mrf.mxu3  ;;  %896 = vmatmul.bf16.gmra.mxu1 %v2505_v38 }
  0xae   :  { %v267_v42 = vadd.f32 %v266_v41, %v2477_v45  ;;  %v171_v44 = vpop.f32.mrf.mxu0  ;;  %v316_v46 = vadd.f32 %v315_v43, %v2480_v47  ;;  %v220_v48 = vpop.f32.mrf.mxu1  ;;  %v1984_v43 = vld [vmem:[#allocation3 + $0x138] sm:$0xf0] }
  0xaf   :  { %v172_v54 = vadd.f32 %v171_v44, %v2470_v30  ;;  %v221_v57 = vadd.f32 %v220_v48, %v2472_v32 }
  0xb0   :  { %v362_v50 = vmax.f32 %v267_v42, 0.0  ;;  %v363_v52 = vmax.f32 %v316_v46, 0.0  ;;  %v2146_v42 = vld [vmem:[#allocation3 + $0x134] sm:$0xf] }
  0xb1   :  { %v364_v1 = vmax.f32 %v172_v54, 0.0  ;;  %v365_v4 = vmax.f32 %v221_v57, 0.0  ;;  %v1987_v48 = vor.u32 %v2146_v42, %v1984_v43 }
  0xb2   :  { %v2512_v53 = vpack.c.bf16 %v362_v50, %v358_v49  ;;  %v2515_v56 = vpack.c.bf16 %v363_v52, %v359_v51 }
  0xb3   :  { %1132 = vmatpush.bf16.msra.mxu2 %v1987_v48  ;;  %v1848_v48 = vld [vmem:[#allocation3 + $0x28] sm:$0xf0] }
  0xb4   :  { %945 = vmatmul.bf16.gmra.mxu2 %v2512_v53  ;;  %994 = vmatmul.bf16.gmra.mxu3 %v2515_v56 }
  0xb5   :  { %v269_v58 = vpop.f32.mrf.mxu2  ;;  %v318_v62 = vpop.f32.mrf.mxu3 }
  0xb6   :  { %v173_v63 = vpop.f32.mrf.mxu0  ;;  %v222_v3 = vpop.f32.mrf.mxu1  ;;  %v270_v19 = vadd.f32 %v269_v58, %v2477_v45  ;;  %v319_v22 = vadd.f32 %v318_v62, %v2480_v47  ;;  %v2114_v58 = vld [vmem:[#allocation3 + $0x34] sm:$0xf] }
  0xb7   :  { %v174_v2 = vadd.f32 %v173_v63, %v2470_v30  ;;  %v223_v5 = vadd.f32 %v222_v3, %v2472_v32  ;;  %v1859_v62 = vor.u32 %v2114_v58, %v1856_v59  ;;  %v2162_v63 = vld [vmem:[#allocation3 + $0x1b4] sm:$0xf]  ;;  %v2128_v58 = vld [vmem:[#allocation3 + $0xa4] sm:$0xf]  ;;  %v1912_v59 = vld [vmem:[#allocation3 + $0xa8] sm:$0xf0] }
  0xb8   :  { %v366_v29 = vmax.f32 %v270_v19, 0.0  ;;  %v367_v34 = vmax.f32 %v319_v22, 0.0  ;;  %v2130_v3 = vld [vmem:[#allocation3 + $0xb4] sm:$0xf] }
  0xb9   :  { %v368_v6 = vmax.f32 %v174_v2, 0.0  ;;  %v369_v10 = vmax.f32 %v223_v5, 0.0  ;;  %v2051_v2 = vor.u32 %v2162_v63, %v2048_v0  ;;  %1034 = vmatpush.bf16.msra.mxu0 %v1859_v62  ;;  %v1915_v63 = vor.u32 %v2128_v58, %v1912_v59 }
  0xbb   :  { %v2522_v15 = vpack.c.bf16 %v368_v6, %v364_v1  ;;  %v2525_v20 = vpack.c.bf16 %v369_v10, %v365_v4  ;;  %v1920_v4 = vld [vmem:[#allocation3 + $0xb8] sm:$0xf0]  ;;  %1181 = vmatpush.bf16.msra.mxu3 %v2051_v2 }
  0xbc   :  { %v1923_v7 = vor.u32 %v2130_v3, %v1920_v4 }
  0xbd   :  { %v271_v23 = vpop.f32.mrf.mxu2  ;;  %852 = vmatmul.bf16.gmra.mxu0 %v2522_v15  ;;  %v320_v25 = vpop.f32.mrf.mxu3  ;;  %901 = vmatmul.bf16.gmra.mxu1 %v2525_v20 }
  0xbe   :  { %v272_v24 = vadd.f32 %v271_v23, %v2477_v45  ;;  %v176_v26 = vpop.f32.mrf.mxu0  ;;  %v321_v27 = vadd.f32 %v320_v25, %v2480_v47  ;;  %v225_v28 = vpop.f32.mrf.mxu1  ;;  %1083 = vmatpush.bf16.msra.mxu1 %v1923_v7 }
  0xbf   :  { %v177_v37 = vadd.f32 %v176_v26, %v2470_v30  ;;  %v226_v40 = vadd.f32 %v225_v28, %v2472_v32  ;;  %v2144_v28 = vld [vmem:[#allocation3 + $0x124] sm:$0xf] }
  0xc0   :  { %v370_v31 = vmax.f32 %v272_v24, 0.0  ;;  %v371_v35 = vmax.f32 %v321_v27, 0.0 }
  0xc1   :  { %v372_v49 = vmax.f32 %v177_v37, 0.0  ;;  %v373_v52 = vmax.f32 %v226_v40, 0.0 }
  0xc2   :  { %v2532_v36 = vpack.c.bf16 %v370_v31, %v366_v29  ;;  %v2535_v39 = vpack.c.bf16 %v371_v35, %v367_v34  ;;  %v1976_v29 = vld [vmem:[#allocation3 + $0x128] sm:$0xf0]  ;;  %1084 = vmatpush.bf16.msra.mxu1 %v1915_v63 }
  0xc3   :  { %v1979_v35 = vor.u32 %v2144_v28, %v1976_v29 }
  0xc4   :  { %950 = vmatmul.bf16.gmra.mxu2 %v2532_v36  ;;  %999 = vmatmul.bf16.gmra.mxu3 %v2535_v39 }
  0xc5   :  { %v274_v41 = vpop.f32.mrf.mxu2  ;;  %v323_v44 = vpop.f32.mrf.mxu3  ;;  %1133 = vmatpush.bf16.msra.mxu2 %v1979_v35 }
  0xc6   :  { %v178_v46 = vpop.f32.mrf.mxu0  ;;  %v227_v51 = vpop.f32.mrf.mxu1  ;;  %v275_v5 = vadd.f32 %v274_v41, %v2477_v45  ;;  %v324_v8 = vadd.f32 %v323_v44, %v2480_v47 }
  0xc7   :  { %v179_v50 = vadd.f32 %v178_v46, %v2470_v30  ;;  %v228_v54 = vadd.f32 %v227_v51, %v2472_v32  ;;  %v2112_v46 = vld [vmem:[#allocation3 + $0x24] sm:$0xf] }
  0xc8   :  { %v374_v18 = vmax.f32 %v275_v5, 0.0  ;;  %v375_v21 = vmax.f32 %v324_v8, 0.0  ;;  %v2160_v51 = vld [vmem:[#allocation3 + $0x1a4] sm:$0xf] }
  0xc9   :  { %v376_v57 = vmax.f32 %v179_v50, 0.0  ;;  %v377_v61 = vmax.f32 %v228_v54, 0.0  ;;  %v1851_v50 = vor.u32 %v2112_v46, %v1848_v48  ;;  %v2158_v46 = vld [vmem:[#allocation3 + $0x194] sm:$0xf]  ;;  %v2032_v48 = vld [vmem:[#allocation3 + $0x198] sm:$0xf0] }
  0xcb   :  { %v2542_v1 = vpack.c.bf16 %v376_v57, %v372_v49  ;;  %v2545_v6 = vpack.c.bf16 %v377_v61, %v373_v52  ;;  %v2040_v52 = vld [vmem:[#allocation3 + $0x1a8] sm:$0xf0]  ;;  %1035 = vmatpush.bf16.msra.mxu0 %v1851_v50  ;;  %v2035_v50 = vor.u32 %v2158_v46, %v2032_v48 }
  0xcc   :  { %v2043_v57 = vor.u32 %v2160_v51, %v2040_v52  ;;  %v2126_v51 = vld [vmem:[#allocation3 + $0x94] sm:$0xf]  ;;  %v1904_v52 = vld [vmem:[#allocation3 + $0x98] sm:$0xf0]  ;;  %v1896_v46 = vld [vmem:[#allocation3 + $0x88] sm:$0xf0] }
  0xcd   :  { %v276_v10 = vpop.f32.mrf.mxu2  ;;  %857 = vmatmul.bf16.gmra.mxu0 %v2542_v1  ;;  %v325_v13 = vpop.f32.mrf.mxu3  ;;  %906 = vmatmul.bf16.gmra.mxu1 %v2545_v6  ;;  %v1907_v59 = vor.u32 %v2126_v51, %v1904_v52 }
  0xce   :  { %v277_v12 = vadd.f32 %v276_v10, %v2477_v45  ;;  %v181_v14 = vpop.f32.mrf.mxu0  ;;  %v326_v16 = vadd.f32 %v325_v13, %v2480_v47  ;;  %v230_v17 = vpop.f32.mrf.mxu1  ;;  %1182 = vmatpush.bf16.msra.mxu3 %v2043_v57 }
  0xcf   :  { %v182_v24 = vadd.f32 %v181_v14, %v2470_v30  ;;  %v231_v26 = vadd.f32 %v230_v17, %v2472_v32  ;;  %1085 = vmatpush.bf16.msra.mxu1 %v1907_v59 }
  0xd0   :  { %v378_v19 = vmax.f32 %v277_v12, 0.0  ;;  %v379_v22 = vmax.f32 %v326_v16, 0.0 }
  0xd1   :  { %v380_v37 = vmax.f32 %v182_v24, 0.0  ;;  %v381_v42 = vmax.f32 %v231_v26, 0.0  ;;  %v1968_v24 = vld [vmem:[#allocation3 + $0x118] sm:$0xf0] }
  0xd2   :  { %v2552_v23 = vpack.c.bf16 %v378_v19, %v374_v18  ;;  %v2555_v25 = vpack.c.bf16 %v379_v22, %v375_v21  ;;  %v2142_v22 = vld [vmem:[#allocation3 + $0x114] sm:$0xf]  ;;  %1183 = vmatpush.bf16.msra.mxu3 %v2035_v50 }
  0xd3   :  { %v1971_v28 = vor.u32 %v2142_v22, %v1968_v24  ;;  %v2140_v22 = vld [vmem:[#allocation3 + $0x104] sm:$0xf]  ;;  %v1960_v24 = vld [vmem:[#allocation3 + $0x108] sm:$0xf0] }
  0xd4   :  { %955 = vmatmul.bf16.gmra.mxu2 %v2552_v23  ;;  %1004 = vmatmul.bf16.gmra.mxu3 %v2555_v25 }
  0xd5   :  { %v279_v27 = vpop.f32.mrf.mxu2  ;;  %v328_v31 = vpop.f32.mrf.mxu3  ;;  %1134 = vmatpush.bf16.msra.mxu2 %v1971_v28 }
  0xd6   :  { %v183_v34 = vpop.f32.mrf.mxu0  ;;  %v232_v41 = vpop.f32.mrf.mxu1  ;;  %v280_v61 = vadd.f32 %v279_v27, %v2477_v45  ;;  %v329_v0 = vadd.f32 %v328_v31, %v2480_v47 }
  0xd7   :  { %v184_v40 = vadd.f32 %v183_v34, %v2470_v30  ;;  %v233_v43 = vadd.f32 %v232_v41, %v2472_v32  ;;  %v2110_v41 = vld [vmem:[#allocation3 + $0x14] sm:$0xf] }
  0xd8   :  { %v382_v10 = vmax.f32 %v280_v61, 0.0  ;;  %v383_v13 = vmax.f32 %v329_v0, 0.0 }
  0xd9   :  { %v384_v44 = vmax.f32 %v184_v40, 0.0  ;;  %v385_v49 = vmax.f32 %v233_v43, 0.0 }
  0xdb   :  { %v2562_v54 = vpack.c.bf16 %v384_v44, %v380_v37  ;;  %v2565_v62 = vpack.c.bf16 %v385_v49, %v381_v42  ;;  %v1840_v42 = vld [vmem:[#allocation3 + $0x18] sm:$0xf0] }
  0xdc   :  { %v1843_v44 = vor.u32 %v2110_v41, %v1840_v42 }
  0xdd   :  { %v281_v2 = vpop.f32.mrf.mxu2  ;;  %862 = vmatmul.bf16.gmra.mxu0 %v2562_v54  ;;  %v330_v4 = vpop.f32.mrf.mxu3  ;;  %911 = vmatmul.bf16.gmra.mxu1 %v2565_v62 }
  0xde   :  { %v282_v3 = vadd.f32 %v281_v2, %v2477_v45  ;;  %v186_v5 = vpop.f32.mrf.mxu0  ;;  %v331_v7 = vadd.f32 %v330_v4, %v2480_v47  ;;  %v235_v8 = vpop.f32.mrf.mxu1  ;;  %1036 = vmatpush.bf16.msra.mxu0 %v1843_v44  ;;  %v2124_v44 = vld [vmem:[#allocation3 + $0x84] sm:$0xf] }
  0xdf   :  { %v187_v17 = vadd.f32 %v186_v5, %v2470_v30  ;;  %v236_v19 = vadd.f32 %v235_v8, %v2472_v32  ;;  %v1899_v51 = vor.u32 %v2124_v44, %v1896_v46 }
  0xe0   :  { %v386_v12 = vmax.f32 %v282_v3, 0.0  ;;  %v387_v14 = vmax.f32 %v331_v7, 0.0 }
  0xe1   :  { %v388_v29 = vmax.f32 %v187_v17, 0.0  ;;  %v389_v35 = vmax.f32 %v236_v19, 0.0  ;;  %1086 = vmatpush.bf16.msra.mxu1 %v1899_v51 }
  0xe2   :  { %v2572_v16 = vpack.c.bf16 %v386_v12, %v382_v10  ;;  %v2575_v18 = vpack.c.bf16 %v387_v14, %v383_v13 }
  0xe4   :  { %960 = vmatmul.bf16.gmra.mxu2 %v2572_v16  ;;  %1009 = vmatmul.bf16.gmra.mxu3 %v2575_v18 }
  0xe5   :  { %v284_v21 = vpop.f32.mrf.mxu2  ;;  %v333_v26 = vpop.f32.mrf.mxu3 }
  0xe6   :  { %v188_v27 = vpop.f32.mrf.mxu0  ;;  %v237_v34 = vpop.f32.mrf.mxu1  ;;  %v285_v57 = vadd.f32 %v284_v21, %v2477_v45  ;;  %v334_v61 = vadd.f32 %v333_v26, %v2480_v47  ;;  %v2108_v26 = vld [vmem:[#allocation3 + $0x4] sm:$0xf] }
  0xe7   :  { %v189_v31 = vadd.f32 %v188_v27, %v2470_v30  ;;  %v238_v37 = vadd.f32 %v237_v34, %v2472_v32  ;;  %v2156_v34 = vld [vmem:[#allocation3 + $0x184] sm:$0xf] }
  0xe8   :  { %v390_v7 = vmax.f32 %v285_v57, 0.0  ;;  %v391_v10 = vmax.f32 %v334_v61, 0.0 }
  0xe9   :  { %v392_v40 = vmax.f32 %v189_v31, 0.0  ;;  %v393_v43 = vmax.f32 %v238_v37, 0.0  ;;  %v1832_v31 = vld [vmem:[#allocation3 + $0x8] sm:$0xf0] }
  0xea   :  { %v1835_v42 = vor.u32 %v2108_v26, %v1832_v31 }
  0xeb   :  { %v2582_v49 = vpack.c.bf16 %v392_v40, %v388_v29  ;;  %v2585_v58 = vpack.c.bf16 %v393_v43, %v389_v35  ;;  %v1963_v29 = vor.u32 %v2140_v22, %v1960_v24  ;;  %v2024_v35 = vld [vmem:[#allocation3 + $0x188] sm:$0xf0] }
  0xec   :  { %v2027_v43 = vor.u32 %v2156_v34, %v2024_v35  ;;  %1037 = vmatpush.bf16.msra.mxu0 %v1835_v42 }
  0xed   :  { %v286_v63 = vpop.f32.mrf.mxu2  ;;  %867 = vmatmul.bf16.gmra.mxu0 %v2582_v49  ;;  %v335_v2 = vpop.f32.mrf.mxu3  ;;  %916 = vmatmul.bf16.gmra.mxu1 %v2585_v58 }
  0xee   :  { %v287_v0 = vadd.f32 %v286_v63, %v2477_v45  ;;  %v191_v3 = vpop.f32.mrf.mxu0  ;;  %v336_v4 = vadd.f32 %v335_v2, %v2480_v47  ;;  %v240_v5 = vpop.f32.mrf.mxu1  ;;  %1135 = vmatpush.bf16.msra.mxu2 %v1963_v29  ;;  %1184 = vmatpush.bf16.msra.mxu3 %v2027_v43 }
  0xef   :  { %v192_v14 = vadd.f32 %v191_v3, %v2470_v30  ;;  %v241_v19 = vadd.f32 %v240_v5, %v2472_v32 }
  0xf0   :  { %v394_v8 = vmax.f32 %v287_v0, 0.0  ;;  %v395_v12 = vmax.f32 %v336_v4, 0.0 }
  0xf1   :  { %v396_v37 = vmax.f32 %v192_v14, 0.0  ;;  %v397_v48 = vmax.f32 %v241_v19, 0.0 }
  0xf2   :  { %v2592_v13 = vpack.c.bf16 %v394_v8, %v390_v7  ;;  %v2595_v17 = vpack.c.bf16 %v395_v12, %v391_v10 }
  0xf4   :  { %965 = vmatmul.bf16.gmra.mxu2 %v2592_v13  ;;  %1014 = vmatmul.bf16.gmra.mxu3 %v2595_v17 }
  0xf5   :  { %v289_v21 = vpop.f32.mrf.mxu2  ;;  %v338_v27 = vpop.f32.mrf.mxu3 }
  0xf6   :  { %v193_v28 = vpop.f32.mrf.mxu0  ;;  %v242_v41 = vpop.f32.mrf.mxu1  ;;  %v290_v61 = vadd.f32 %v289_v21, %v2477_v45  ;;  %v339_v0 = vadd.f32 %v338_v27, %v2480_v47 }
  0xf7   :  { %v194_v40 = vadd.f32 %v193_v28, %v2470_v30  ;;  %v243_v50 = vadd.f32 %v242_v41, %v2472_v32 }
  0xf8   :  { %v398_v10 = vmax.f32 %v290_v61, 0.0  ;;  %v399_v14 = vmax.f32 %v339_v0, 0.0 }
  0xf9   :  { %v400_v52 = vmax.f32 %v194_v40, 0.0  ;;  %v401_v57 = vmax.f32 %v243_v50, 0.0 }
  0xfb   :  { %v2602_v59 = vpack.c.bf16 %v400_v52, %v396_v37  ;;  %v2605_v63 = vpack.c.bf16 %v401_v57, %v397_v48 }
  0xfd   :  { %v291_v2 = vpop.f32.mrf.mxu2  ;;  %872 = vmatmul.bf16.gmra.mxu0 %v2602_v59  ;;  %v340_v4 = vpop.f32.mrf.mxu3  ;;  %921 = vmatmul.bf16.gmra.mxu1 %v2605_v63 }
  0xfe   :  { %v292_v3 = vadd.f32 %v291_v2, %v2477_v45  ;;  %v196_v5 = vpop.f32.mrf.mxu0  ;;  %v341_v7 = vadd.f32 %v340_v4, %v2480_v47  ;;  %v245_v8 = vpop.f32.mrf.mxu1  ;;  %v2640_v4 = vld [vmem:[%s3262_s4] sm:$0x3] }
  0xff   :  { %v197_v22 = vadd.f32 %v196_v5, %v2470_v30  ;;  %v246_v26 = vadd.f32 %v245_v8, %v2472_v32 }
 0x100   :  { %v402_v12 = vmax.f32 %v292_v3, 0.0  ;;  %v403_v19 = vmax.f32 %v341_v7, 0.0 }
 0x101   :  { %v404_v31 = vmax.f32 %v197_v22, 0.0  ;;  %v405_v37 = vmax.f32 %v246_v26, 0.0 }
 0x102   :  { %v2612_v21 = vpack.c.bf16 %v402_v12, %v398_v10  ;;  %v2615_v24 = vpack.c.bf16 %v403_v19, %v399_v14 }
 0x104   :  { %970 = vmatmul.bf16.gmra.mxu2 %v2612_v21  ;;  %1019 = vmatmul.bf16.gmra.mxu3 %v2615_v24 }
 0x105   :  { %v294_v27 = vpop.f32.mrf.mxu2  ;;  %v343_v28 = vpop.f32.mrf.mxu3 }
 0x106   :  { %v198_v29 = vpop.f32.mrf.mxu0  ;;  %v247_v35 = vpop.f32.mrf.mxu1  ;;  %v295_v44 = vadd.f32 %v294_v27, %v2477_v45  ;;  %v344_v48 = vadd.f32 %v343_v28, %v2480_v47 }
 0x107   :  { %v199_v34 = vadd.f32 %v198_v29, %v2470_v30  ;;  %v248_v40 = vadd.f32 %v247_v35, %v2472_v32 }
 0x108   :  { %v406_v52 = vmax.f32 %v295_v44, 0.0  ;;  %v407_v61 = vmax.f32 %v344_v48, 0.0 }
 0x109   :  { %v408_v41 = vmax.f32 %v199_v34, 0.0  ;;  %v409_v42 = vmax.f32 %v248_v40, 0.0 }
 0x10b   :  { %v2622_v43 = vpack.c.bf16 %v408_v41, %v404_v31  ;;  %v2625_v46 = vpack.c.bf16 %v409_v42, %v405_v37 }
 0x10d   :  { %v296_v50 = vpop.f32.mrf.mxu2  ;;  %877 = vmatmul.bf16.gmra.mxu0 %v2622_v43  ;;  %v345_v30 = vpop.f32.mrf.mxu3  ;;  %926 = vmatmul.bf16.gmra.mxu1 %v2625_v46 }
 0x10e   :  { %v297_v51 = vadd.f32 %v296_v50, %v2477_v45  ;;  %v346_v32 = vadd.f32 %v345_v30, %v2480_v47  ;;  %v2644_v45 = vperm.slane %v2640_v4, 0 }
 0x110   :  { %v410_v57 = vmax.f32 %v297_v51, 0.0  ;;  %v411_v0 = vmax.f32 %v346_v32, 0.0 }
 0x112   :  { %v2632_v2 = vpack.c.bf16 %v410_v57, %v406_v52  ;;  %v2634_v3 = vpack.c.bf16 %v411_v0, %v407_v61 }
 0x114   :  { %975 = vmatmul.bf16.gmra.mxu2 %v2632_v2  ;;  %1024 = vmatmul.bf16.gmra.mxu3 %v2634_v3 }
 0x11a   :  { %v843_v47 = vpop.f32.mrf.mxu0  ;;  %v892_v7 = vpop.f32.mrf.mxu1 }
 0x11b   :  { %v844_v5 = vadd.f32 %v843_v47, %v2644_v45 }
 0x11d   :  { %v893_v8 = vadd.f32 %v892_v7, %v844_v5  ;;  %1038 = vmatmul.bf16.vlgmr.msra.gmra.mxu0 %v2482_v55  ;;  %1087 = vmatmul.bf16.vlgmr.msra.gmra.mxu1 %v2485_v60 }
 0x122   :  { %v845_v10 = vpop.f32.mrf.mxu0  ;;  %v894_v14 = vpop.f32.mrf.mxu1 }
 0x123   :  { %v846_v12 = vadd.f32 %v845_v10, %v2644_v45 }
 0x124   :  { %1136 = vmatmul.bf16.vlgmr.msra.gmra.mxu2 %v2492_v9  ;;  %1185 = vmatmul.bf16.vlgmr.msra.gmra.mxu3 %v2495_v11 }
 0x125   :  { %v895_v19 = vadd.f32 %v894_v14, %v846_v12 }
 0x127   :  { %v941_v22 = vpop.f32.mrf.mxu2  ;;  %v990_v27 = vpop.f32.mrf.mxu3 }
 0x128   :  { %v942_v26 = vadd.f32 %v941_v22, %v893_v8 }
 0x12a   :  { %v2652_v28 = vadd.f32 %v990_v27, %v942_v26  ;;  %v848_v29 = vpop.f32.mrf.mxu0  ;;  %v897_v55 = vpop.f32.mrf.mxu1 }
 0x12b   :  { %v849_v31 = vadd.f32 %v848_v29, %v2644_v45 }
 0x12d   :  { %v898_v34 = vadd.f32 %v897_v55, %v849_v31  ;;  %1043 = vmatmul.bf16.gmra.mxu0 %v2502_v33  ;;  %1092 = vmatmul.bf16.gmra.mxu1 %v2505_v38 }
 0x12f   :  { %v943_v60 = vpop.f32.mrf.mxu2  ;;  %v992_v9 = vpop.f32.mrf.mxu3 }
 0x130   :  { %v944_v35 = vadd.f32 %v943_v60, %v895_v19 }
 0x132   :  { %v2657_v37 = vadd.f32 %v992_v9, %v944_v35  ;;  %v850_v11 = vpop.f32.mrf.mxu0  ;;  %v899_v41 = vpop.f32.mrf.mxu1 }
 0x133   :  { %v851_v40 = vadd.f32 %v850_v11, %v2644_v45 }
 0x134   :  { %1141 = vmatmul.bf16.gmra.mxu2 %v2512_v53  ;;  %1190 = vmatmul.bf16.gmra.mxu3 %v2515_v56 }
 0x135   :  { %v900_v42 = vadd.f32 %v899_v41, %v851_v40 }
 0x137   :  { %v946_v44 = vpop.f32.mrf.mxu2  ;;  %v995_v50 = vpop.f32.mrf.mxu3 }
 0x138   :  { %v947_v48 = vadd.f32 %v946_v44, %v898_v34 }
 0x13a   :  { %v2662_v33 = vadd.f32 %v995_v50, %v947_v48  ;;  %v853_v38 = vpop.f32.mrf.mxu0  ;;  %v902_v30 = vpop.f32.mrf.mxu1 }
 0x13b   :  { %v854_v51 = vadd.f32 %v853_v38, %v2644_v45 }
 0x13d   :  { %v903_v32 = vadd.f32 %v902_v30, %v854_v51  ;;  %1048 = vmatmul.bf16.gmra.mxu0 %v2522_v15  ;;  %1097 = vmatmul.bf16.gmra.mxu1 %v2525_v20 }
 0x13f   :  { %v948_v52 = vpop.f32.mrf.mxu2  ;;  %v997_v53 = vpop.f32.mrf.mxu3 }
 0x140   :  { %v949_v57 = vadd.f32 %v948_v52, %v900_v42 }
 0x142   :  { %v2667_v61 = vadd.f32 %v997_v53, %v949_v57  ;;  %v855_v56 = vpop.f32.mrf.mxu0  ;;  %v904_v47 = vpop.f32.mrf.mxu1 }
 0x143   :  { %v856_v0 = vadd.f32 %v855_v56, %v2644_v45 }
 0x144   :  { %1146 = vmatmul.bf16.gmra.mxu2 %v2532_v36  ;;  %1195 = vmatmul.bf16.gmra.mxu3 %v2535_v39 }
 0x145   :  { %v905_v5 = vadd.f32 %v904_v47, %v856_v0 }
 0x147   :  { %v951_v7 = vpop.f32.mrf.mxu2  ;;  %v1000_v10 = vpop.f32.mrf.mxu3 }
 0x148   :  { %v952_v8 = vadd.f32 %v951_v7, %v903_v32 }
 0x14a   :  { %v2672_v15 = vadd.f32 %v1000_v10, %v952_v8  ;;  %v858_v20 = vpop.f32.mrf.mxu0  ;;  %v907_v14 = vpop.f32.mrf.mxu1 }
 0x14b   :  { %v859_v12 = vadd.f32 %v858_v20, %v2644_v45 }
 0x14d   :  { %v908_v19 = vadd.f32 %v907_v14, %v859_v12  ;;  %1053 = vmatmul.bf16.gmra.mxu0 %v2542_v1  ;;  %1102 = vmatmul.bf16.gmra.mxu1 %v2545_v6 }
 0x14f   :  { %v953_v22 = vpop.f32.mrf.mxu2  ;;  %v1002_v36 = vpop.f32.mrf.mxu3 }
 0x150   :  { %v954_v26 = vadd.f32 %v953_v22, %v905_v5 }
 0x152   :  { %v2677_v27 = vadd.f32 %v1002_v36, %v954_v26  ;;  %v860_v39 = vpop.f32.mrf.mxu0  ;;  %v909_v31 = vpop.f32.mrf.mxu1 }
 0x153   :  { %v861_v29 = vadd.f32 %v860_v39, %v2644_v45 }
 0x154   :  { %1151 = vmatmul.bf16.gmra.mxu2 %v2552_v23  ;;  %1200 = vmatmul.bf16.gmra.mxu3 %v2555_v25 }
 0x155   :  { %v910_v55 = vadd.f32 %v909_v31, %v861_v29 }
 0x157   :  { %v956_v34 = vpop.f32.mrf.mxu2  ;;  %v1005_v35 = vpop.f32.mrf.mxu3 }
 0x158   :  { %v957_v60 = vadd.f32 %v956_v34, %v908_v19 }
 0x15a   :  { %v2682_v1 = vadd.f32 %v1005_v35, %v957_v60  ;;  %v863_v6 = vpop.f32.mrf.mxu0  ;;  %v912_v11 = vpop.f32.mrf.mxu1 }
 0x15b   :  { %v864_v9 = vadd.f32 %v863_v6, %v2644_v45 }
 0x15d   :  { %v913_v40 = vadd.f32 %v912_v11, %v864_v9  ;;  %1058 = vmatmul.bf16.gmra.mxu0 %v2562_v54  ;;  %1107 = vmatmul.bf16.gmra.mxu1 %v2565_v62 }
 0x15f   :  { %v958_v41 = vpop.f32.mrf.mxu2  ;;  %v1007_v23 = vpop.f32.mrf.mxu3 }
 0x160   :  { %v959_v42 = vadd.f32 %v958_v41, %v910_v55 }
 0x162   :  { %v2687_v44 = vadd.f32 %v1007_v23, %v959_v42  ;;  %v865_v25 = vpop.f32.mrf.mxu0  ;;  %v914_v50 = vpop.f32.mrf.mxu1 }
 0x163   :  { %v866_v48 = vadd.f32 %v865_v25, %v2644_v45 }
 0x164   :  { %1156 = vmatmul.bf16.gmra.mxu2 %v2572_v16  ;;  %1205 = vmatmul.bf16.gmra.mxu3 %v2575_v18 }
 0x165   :  { %v915_v38 = vadd.f32 %v914_v50, %v866_v48 }
 0x167   :  { %v961_v51 = vpop.f32.mrf.mxu2  ;;  %v1010_v32 = vpop.f32.mrf.mxu3 }
 0x168   :  { %v962_v30 = vadd.f32 %v961_v51, %v913_v40 }
 0x16a   :  { %v2692_v54 = vadd.f32 %v1010_v32, %v962_v30  ;;  %v868_v62 = vpop.f32.mrf.mxu0  ;;  %v917_v57 = vpop.f32.mrf.mxu1  ;;  %v2725_v32 = vperm.slane %v2640_v4, 1  ;;  %v1226_v4 = vmax.f32 %v2652_v28, 0.0 }
 0x16b   :  { %v869_v52 = vadd.f32 %v868_v62, %v2644_v45 }
 0x16d   :  { %v918_v53 = vadd.f32 %v917_v57, %v869_v52  ;;  %1063 = vmatmul.bf16.gmra.mxu0 %v2582_v49  ;;  %1112 = vmatmul.bf16.gmra.mxu1 %v2585_v58 }
 0x16f   :  { %v963_v56 = vpop.f32.mrf.mxu2  ;;  %v1012_v16 = vpop.f32.mrf.mxu3 }
 0x170   :  { %v964_v0 = vadd.f32 %v963_v56, %v915_v38 }
 0x172   :  { %v2697_v47 = vadd.f32 %v1012_v16, %v964_v0  ;;  %v870_v18 = vpop.f32.mrf.mxu0  ;;  %v919_v7 = vpop.f32.mrf.mxu1 }
 0x173   :  { %v871_v5 = vadd.f32 %v870_v18, %v2644_v45 }
 0x174   :  { %1161 = vmatmul.bf16.gmra.mxu2 %v2592_v13  ;;  %1210 = vmatmul.bf16.gmra.mxu3 %v2595_v17 }
 0x175   :  { %v920_v8 = vadd.f32 %v919_v7, %v871_v5 }
 0x177   :  { %v966_v10 = vpop.f32.mrf.mxu2  ;;  %v1015_v12 = vpop.f32.mrf.mxu3 }
 0x178   :  { %v967_v20 = vadd.f32 %v966_v10, %v918_v53 }
 0x17a   :  { %v2702_v49 = vadd.f32 %v1015_v12, %v967_v20  ;;  %v873_v58 = vpop.f32.mrf.mxu0  ;;  %v922_v19 = vpop.f32.mrf.mxu1 }
 0x17b   :  { %v874_v14 = vadd.f32 %v873_v58, %v2644_v45 }
 0x17d   :  { %v923_v22 = vadd.f32 %v922_v19, %v874_v14  ;;  %1068 = vmatmul.bf16.gmra.mxu0 %v2602_v59  ;;  %1117 = vmatmul.bf16.gmra.mxu1 %v2605_v63 }
 0x17f   :  { %v968_v26 = vpop.f32.mrf.mxu2  ;;  %v1017_v13 = vpop.f32.mrf.mxu3 }
 0x180   :  { %v969_v36 = vadd.f32 %v968_v26, %v920_v8 }
 0x182   :  { %v2707_v39 = vadd.f32 %v1017_v13, %v969_v36  ;;  %v875_v17 = vpop.f32.mrf.mxu0  ;;  %v924_v31 = vpop.f32.mrf.mxu1 }
 0x183   :  { %v876_v29 = vadd.f32 %v875_v17, %v2644_v45 }
 0x184   :  { %1166 = vmatmul.bf16.gmra.mxu2 %v2612_v21  ;;  %1215 = vmatmul.bf16.gmra.mxu3 %v2615_v24 }
 0x185   :  { %v925_v55 = vadd.f32 %v924_v31, %v876_v29  ;;  %v1228_v31 = vmax.f32 %v2657_v37, 0.0 }
 0x187   :  { %v971_v34 = vpop.f32.mrf.mxu2  ;;  %v1020_v35 = vpop.f32.mrf.mxu3 }
 0x188   :  { %v972_v60 = vadd.f32 %v971_v34, %v923_v22 }
 0x18a   :  { %v2712_v59 = vadd.f32 %v1020_v35, %v972_v60  ;;  %v878_v63 = vpop.f32.mrf.mxu0  ;;  %v927_v9 = vpop.f32.mrf.mxu1 }
 0x18b   :  { %v879_v6 = vadd.f32 %v878_v63, %v2644_v45 }
 0x18d   :  { %v928_v11 = vadd.f32 %v927_v9, %v879_v6  ;;  %1073 = vmatmul.bf16.gmra.mxu0 %v2622_v43  ;;  %1122 = vmatmul.bf16.gmra.mxu1 %v2625_v46 }
 0x18f   :  { %v973_v40 = vpop.f32.mrf.mxu2  ;;  %v1022_v21 = vpop.f32.mrf.mxu3 }
 0x190   :  { %v974_v41 = vadd.f32 %v973_v40, %v925_v55 }
 0x192   :  { %v2717_v42 = vadd.f32 %v1022_v21, %v974_v41  ;;  %v880_v24 = vpop.f32.mrf.mxu0  ;;  %v929_v25 = vpop.f32.mrf.mxu1 }
 0x193   :  { %v881_v23 = vadd.f32 %v880_v24, %v2644_v45  ;;  %v1230_v24 = vmax.f32 %v2662_v33, 0.0 }
 0x194   :  { %1171 = vmatmul.bf16.gmra.mxu2 %v2632_v2  ;;  %1220 = vmatmul.bf16.gmra.mxu3 %v2634_v3  ;;  %v1258_v3 = vld [vmem:[%s3263_s5] sm:$0x3] }
 0x195   :  { %v930_v48 = vadd.f32 %v929_v25, %v881_v23  ;;  %v2733_v7 = vperm.slane %v1258_v3, 0  ;;  %v2737_v12 = vperm.slane %v1258_v3, 1 }
 0x197   :  { %v976_v50 = vpop.f32.mrf.mxu2  ;;  %v1025_v51 = vpop.f32.mrf.mxu3  ;;  %v1264_v22 = vmul.f32 %v2733_v7, %v1226_v4  ;;  %v1266_v9 = vmul.f32 %v2733_v7, %v1228_v31 }
 0x198   :  { %v977_v38 = vadd.f32 %v976_v50, %v928_v11 }
 0x19a   :  { %v2722_v43 = vadd.f32 %v1025_v51, %v977_v38  ;;  %v1039_v46 = vpop.f32.mrf.mxu0  ;;  %v1088_v30 = vpop.f32.mrf.mxu1  ;;  %v1268_v51 = vmul.f32 %v2733_v7, %v1230_v24 }
 0x19b   :  { %v1040_v45 = vadd.f32 %v1039_v46, %v2725_v32 }
 0x19d   :  { %v1089_v0 = vadd.f32 %v1088_v30, %v1040_v45  ;;  %v1232_v45 = vmax.f32 %v2667_v61, 0.0 }
 0x19f   :  { %v978_v62 = vpop.f32.mrf.mxu2  ;;  %v1027_v57 = vpop.f32.mrf.mxu3 }
 0x1a0   :  { %v979_v52 = vadd.f32 %v978_v62, %v930_v48 }
 0x1a2   :  { %v2728_v53 = vadd.f32 %v1027_v57, %v979_v52  ;;  %v1041_v2 = vpop.f32.mrf.mxu0  ;;  %v1090_v56 = vpop.f32.mrf.mxu1 }
 0x1a3   :  { %v1042_v8 = vadd.f32 %v1041_v2, %v2725_v32 }
 0x1a5   :  { %v1091_v19 = vadd.f32 %v1090_v56, %v1042_v8 }
 0x1a7   :  { %v1137_v16 = vpop.f32.mrf.mxu2  ;;  %v1186_v5 = vpop.f32.mrf.mxu3 }
 0x1a8   :  { %v1138_v18 = vadd.f32 %v1137_v16, %v1089_v0 }
 0x1aa   :  { %v1187_v10 = vadd.f32 %v1186_v5, %v1138_v18  ;;  %v1044_v20 = vpop.f32.mrf.mxu0  ;;  %v1093_v58 = vpop.f32.mrf.mxu1  ;;  %v1270_v5 = vmul.f32 %v2733_v7, %v1232_v45 }
 0x1ab   :  { %v1045_v28 = vadd.f32 %v1044_v20, %v2725_v32 }
 0x1ac   :  { %v1227_v14 = vmax.f32 %v1187_v10, 0.0 }
 0x1ad   :  { %v1094_v63 = vadd.f32 %v1093_v58, %v1045_v28  ;;  %v1234_v58 = vmax.f32 %v2672_v15, 0.0 }
 0x1ae   :  { %v1265_v26 = vmul.f32 %v2737_v12, %v1227_v14 }
 0x1af   :  { %v1139_v36 = vpop.f32.mrf.mxu2  ;;  %v1188_v17 = vpop.f32.mrf.mxu3 }
 0x1b0   :  { %v1140_v13 = vadd.f32 %v1139_v36, %v1091_v19  ;;  %v1296_v29 = vadd.f32 %v1265_v26, %v1264_v22 }
 0x1b2   :  { %v1189_v55 = vadd.f32 %v1188_v17, %v1140_v13  ;;  %1297 = vadd.xlane.f32.xlu0 %v1296_v29  ;;  %v1046_v34 = vpop.f32.mrf.mxu0  ;;  %v1095_v60 = vpop.f32.mrf.mxu1  ;;  %v1272_v13 = vmul.f32 %v2733_v7, %v1234_v58  ;;  %v1242_v58 = vmax.f32 %v2692_v54, 0.0 }
 0x1b3   :  { %v1047_v37 = vadd.f32 %v1046_v34, %v2725_v32  ;;  %v1236_v34 = vmax.f32 %v2677_v27, 0.0 }
 0x1b4   :  { %v1229_v35 = vmax.f32 %v1189_v55, 0.0 }
 0x1b5   :  { %v1096_v38 = vadd.f32 %v1095_v60, %v1047_v37 }
 0x1b6   :  { %v1267_v6 = vmul.f32 %v2737_v12, %v1229_v35 }
 0x1b7   :  { %v1142_v11 = vpop.f32.mrf.mxu2  ;;  %v1191_v41 = vpop.f32.mrf.mxu3 }
 0x1b8   :  { %v1143_v40 = vadd.f32 %v1142_v11, %v1094_v63  ;;  %v1299_v21 = vadd.f32 %v1267_v6, %v1266_v9 }
 0x1ba   :  { %v1192_v23 = vadd.f32 %v1191_v41, %v1143_v40  ;;  %1300 = vadd.xlane.f32.xlu0 %v1299_v21  ;;  %v1049_v25 = vpop.f32.mrf.mxu0  ;;  %v1098_v48 = vpop.f32.mrf.mxu1  ;;  %v1274_v40 = vmul.f32 %v2733_v7, %v1236_v34 }
 0x1bb   :  { %v1050_v33 = vadd.f32 %v1049_v25, %v2725_v32 }
 0x1bc   :  { %v1231_v50 = vmax.f32 %v1192_v23, 0.0  ;;  %v1238_v23 = vmax.f32 %v2682_v1, 0.0 }
 0x1bd   :  { %v1099_v16 = vadd.f32 %v1098_v48, %v1050_v33  ;;  %v1240_v33 = vmax.f32 %v2687_v44, 0.0 }
 0x1be   :  { %v1269_v46 = vmul.f32 %v2737_v12, %v1231_v50 }
 0x1bf   :  { %v1144_v30 = vpop.f32.mrf.mxu2  ;;  %v1193_v52 = vpop.f32.mrf.mxu3 }
 0x1c0   :  { %v1145_v62 = vadd.f32 %v1144_v30, %v1096_v38  ;;  %v1302_v57 = vadd.f32 %v1269_v46, %v1268_v51  ;;  %v1276_v51 = vmul.f32 %v2733_v7, %v1238_v23 }
 0x1c2   :  { %v1194_v2 = vadd.f32 %v1193_v52, %v1145_v62  ;;  %1303 = vadd.xlane.f32.xlu1 %v1302_v57  ;;  %v1051_v56 = vpop.f32.mrf.mxu0  ;;  %v1100_v3 = vpop.f32.mrf.mxu1 }
 0x1c3   :  { %v1052_v61 = vadd.f32 %v1051_v56, %v2725_v32 }
 0x1c4   :  { %v1233_v0 = vmax.f32 %v1194_v2, 0.0 }
 0x1c5   :  { %v1101_v36 = vadd.f32 %v1100_v3, %v1052_v61 }
 0x1c6   :  { %v1271_v18 = vmul.f32 %v2737_v12, %v1233_v0 }
 0x1c7   :  { %v1147_v4 = vpop.f32.mrf.mxu2  ;;  %v1196_v10 = vpop.f32.mrf.mxu3 }
 0x1c8   :  { %v1148_v8 = vadd.f32 %v1147_v4, %v1099_v16  ;;  %v1305_v20 = vadd.f32 %v1271_v18, %v1270_v5  ;;  %v1278_v5 = vmul.f32 %v2733_v7, %v1240_v33 }
 0x1ca   :  { %v1197_v14 = vadd.f32 %v1196_v10, %v1148_v8  ;;  %1306 = vadd.xlane.f32.xlu1 %v1305_v20  ;;  %v1054_v19 = vpop.f32.mrf.mxu0  ;;  %v1103_v22 = vpop.f32.mrf.mxu1 }
 0x1cb   :  { %v1055_v15 = vadd.f32 %v1054_v19, %v2725_v32 }
 0x1cc   :  { %v1235_v26 = vmax.f32 %v1197_v14, 0.0 }
 0x1cd   :  { %v1104_v9 = vadd.f32 %v1103_v22, %v1055_v15 }
 0x1ce   :  { %v1273_v17 = vmul.f32 %v2737_v12, %v1235_v26  ;;  %v1280_v26 = vmul.f32 %v2733_v7, %v1242_v58 }
 0x1cf   :  { %v1149_v29 = vpop.f32.mrf.mxu2  ;;  %v1198_v28 = vpop.f32.mrf.mxu3 }
 0x1d0   :  { %v1150_v31 = vadd.f32 %v1149_v29, %v1101_v36  ;;  %v1308_v55 = vadd.f32 %v1273_v17, %v1272_v13 }
 0x1d2   :  { %v1199_v60 = vadd.f32 %v1198_v28, %v1150_v31  ;;  %1309 = vadd.xlane.f32.xlu2 %v1308_v55  ;;  %v1056_v35 = vpop.f32.mrf.mxu0  ;;  %v1105_v63 = vpop.f32.mrf.mxu1  ;;  %v1244_v55 = vmax.f32 %v2697_v47, 0.0 }
 0x1d3   :  { %v1057_v27 = vadd.f32 %v1056_v35, %v2725_v32 }
 0x1d4   :  { %v1237_v6 = vmax.f32 %v1199_v60, 0.0 }
 0x1d5   :  { %v1106_v46 = vadd.f32 %v1105_v63, %v1057_v27  ;;  %v1282_v63 = vmul.f32 %v2733_v7, %v1244_v55 }
 0x1d6   :  { %v1275_v11 = vmul.f32 %v2737_v12, %v1237_v6 }
 0x1d7   :  { %v1152_v41 = vpop.f32.mrf.mxu2  ;;  %v1201_v24 = vpop.f32.mrf.mxu3 }
 0x1d8   :  { %v1153_v21 = vadd.f32 %v1152_v41, %v1104_v9  ;;  %v1311_v37 = vadd.f32 %v1275_v11, %v1274_v40 }
 0x1da   :  { %v1202_v25 = vadd.f32 %v1201_v24, %v1153_v21  ;;  %1312 = vadd.xlane.f32.xlu2 %v1311_v37  ;;  %v1059_v48 = vpop.f32.mrf.mxu0  ;;  %v1108_v50 = vpop.f32.mrf.mxu1  ;;  %v1246_v24 = vmax.f32 %v2702_v49, 0.0 }
 0x1db   :  { %v1060_v1 = vadd.f32 %v1059_v48, %v2725_v32 }
 0x1dc   :  { %v1239_v38 = vmax.f32 %v1202_v25, 0.0  ;;  %v1284_v25 = vmul.f32 %v2733_v7, %v1246_v24 }
 0x1dd   :  { %v1109_v16 = vadd.f32 %v1108_v50, %v1060_v1 }
 0x1de   :  { %v1277_v30 = vmul.f32 %v2737_v12, %v1239_v38 }
 0x1df   :  { %v1154_v62 = vpop.f32.mrf.mxu2  ;;  %v1203_v57 = vpop.f32.mrf.mxu3 }
 0x1e0   :  { %v1155_v52 = vadd.f32 %v1154_v62, %v1106_v46  ;;  %v1314_v45 = vadd.f32 %v1277_v30, %v1276_v51 }
 0x1e2   :  { %v1204_v2 = vadd.f32 %v1203_v57, %v1155_v52  ;;  %1315 = vadd.xlane.f32.xlu0 %v1314_v45  ;;  %v1061_v56 = vpop.f32.mrf.mxu0  ;;  %v1110_v3 = vpop.f32.mrf.mxu1  ;;  %v1248_v52 = vmax.f32 %v2707_v39, 0.0 }
 0x1e3   :  { %v1062_v44 = vadd.f32 %v1061_v56, %v2725_v32 }
 0x1e4   :  { %v1241_v0 = vmax.f32 %v1204_v2, 0.0  ;;  %v1286_v1 = vmul.f32 %v2733_v7, %v1248_v52 }
 0x1e5   :  { %v1111_v36 = vadd.f32 %v1110_v3, %v1062_v44 }
 0x1e6   :  { %v1279_v18 = vmul.f32 %v2737_v12, %v1241_v0 }
 0x1e7   :  { %v1157_v4 = vpop.f32.mrf.mxu2  ;;  %v1206_v10 = vpop.f32.mrf.mxu3 }
 0x1e8   :  { %v1158_v8 = vadd.f32 %v1157_v4, %v1109_v16  ;;  %v1317_v20 = vadd.f32 %v1279_v18, %v1278_v5  ;;  %v1250_v4 = vmax.f32 %v2712_v59, 0.0 }
 0x1ea   :  { %v1207_v61 = vadd.f32 %v1206_v10, %v1158_v8  ;;  %1318 = vadd.xlane.f32.xlu1 %v1317_v20  ;;  %v1064_v14 = vpop.f32.mrf.mxu0  ;;  %v1113_v19 = vpop.f32.mrf.mxu1  ;;  %v1288_v58 = vmul.f32 %v2733_v7, %v1250_v4 }
 0x1eb   :  { %v1065_v54 = vadd.f32 %v1064_v14, %v2725_v32 }
 0x1ec   :  { %v1243_v22 = vmax.f32 %v1207_v61, 0.0 }
 0x1ed   :  { %v1114_v6 = vadd.f32 %v1113_v19, %v1065_v54 }
 0x1ee   :  { %v1281_v13 = vmul.f32 %v2737_v12, %v1243_v22 }
 0x1ef   :  { %v1159_v17 = vpop.f32.mrf.mxu2  ;;  %v1208_v31 = vpop.f32.mrf.mxu3 }
 0x1f0   :  { %v1160_v29 = vadd.f32 %v1159_v17, %v1111_v36  ;;  %v1320_v28 = vadd.f32 %v1281_v13, %v1280_v26  ;;  %v1252_v36 = vmax.f32 %v2717_v42, 0.0 }
 0x1f2   :  { %v1209_v34 = vadd.f32 %v1208_v31, %v1160_v29  ;;  %1321 = vadd.xlane.f32.xlu2 %v1320_v28  ;;  %v1066_v15 = vpop.f32.mrf.mxu0  ;;  %v1115_v35 = vpop.f32.mrf.mxu1  ;;  %v1290_v31 = vmul.f32 %v2733_v7, %v1252_v36 }
 0x1f3   :  { %v1067_v47 = vadd.f32 %v1066_v15, %v2725_v32 }
 0x1f4   :  { %v1245_v60 = vmax.f32 %v1209_v34, 0.0 }
 0x1f5   :  { %v1116_v48 = vadd.f32 %v1115_v35, %v1067_v47 }
 0x1f6   :  { %v1283_v9 = vmul.f32 %v2737_v12, %v1245_v60 }
 0x1f7   :  { %v1162_v11 = vpop.f32.mrf.mxu2  ;;  %v1211_v41 = vpop.f32.mrf.mxu3 }
 0x1f8   :  { %v1163_v40 = vadd.f32 %v1162_v11, %v1114_v6  ;;  %v1323_v21 = vadd.f32 %v1283_v9, %v1282_v63  ;;  %v1254_v63 = vmax.f32 %v2722_v43, 0.0 }
 0x1fa   :  { %v1212_v37 = vadd.f32 %v1211_v41, %v1163_v40  ;;  %1324 = vadd.xlane.f32.xlu0 %v1323_v21  ;;  %v1069_v23 = vpop.f32.mrf.mxu0  ;;  %v1118_v38 = vpop.f32.mrf.mxu1  ;;  %v1292_v40 = vmul.f32 %v2733_v7, %v1254_v63  ;;  %v1682_v63 = vlaneseq }
 0x1fb   :  { %v1070_v49 = vadd.f32 %v1069_v23, %v2725_v32 }
 0x1fc   :  { %v1247_v27 = vmax.f32 %v1212_v37, 0.0 }
 0x1fd   :  { %v1119_v2 = vadd.f32 %v1118_v38, %v1070_v49 }
 0x1fe   :  { %v1285_v50 = vmul.f32 %v2737_v12, %v1247_v27  ;;  %v1256_v27 = vmax.f32 %v2728_v53, 0.0 }
 0x1ff   :  { %v1164_v51 = vpop.f32.mrf.mxu2  ;;  %v1213_v30 = vpop.f32.mrf.mxu3 }
 0x200   :  { %v1165_v46 = vadd.f32 %v1164_v51, %v1116_v48  ;;  %v1326_v62 = vadd.f32 %v1285_v50, %v1284_v25  ;;  %v2803_v51 = vstv %s3264_s6  ;;  %s2295_s6 = smov [#allocation6]  }
 0x201   :  { %s1752_s25 = sshll.u32 %s2295_s6, 4  ;;  %s1753_s25 = int_to_ptr.vmem [resolvable:$true] %s1752_s25 }
 0x202   :  { %v1214_v57 = vadd.f32 %v1213_v30, %v1165_v46  ;;  %1327 = vadd.xlane.f32.xlu1 %v1326_v62  ;;  %v1071_v45 = vpop.f32.mrf.mxu0  ;;  %v1120_v5 = vpop.f32.mrf.mxu1 }
 0x203   :  { %v1072_v39 = vadd.f32 %v1071_v45, %v2725_v32 }
 0x204   :  { %v1249_v33 = vmax.f32 %v1214_v57, 0.0 }
 0x205   :  { %v1121_v44 = vadd.f32 %v1120_v5, %v1072_v39 }
 0x206   :  { %v1287_v56 = vmul.f32 %v2737_v12, %v1249_v33 }
 0x207   :  { %v1167_v3 = vpop.f32.mrf.mxu2  ;;  %v1216_v16 = vpop.f32.mrf.mxu3 }
 0x208   :  { %v1168_v0 = vadd.f32 %v1167_v3, %v1119_v2  ;;  %v1329_v18 = vadd.f32 %v1287_v56, %v1286_v1 }
 0x20a   :  { %v1217_v8 = vadd.f32 %v1216_v16, %v1168_v0  ;;  %1330 = vadd.xlane.f32.xlu2 %v1329_v18  ;;  %v1074_v20 = vpop.f32.mrf.mxu0  ;;  %v1123_v17 = vpop.f32.mrf.mxu1 }
 0x20b   :  { %v1075_v13 = vadd.f32 %v1074_v20, %v2725_v32 }
 0x20c   :  { %v1251_v10 = vmax.f32 %v1217_v8, 0.0 }
 0x20d   :  { %v1124_v28 = vadd.f32 %v1123_v17, %v1075_v13 }
 0x20e   :  { %v1289_v61 = vmul.f32 %v2737_v12, %v1251_v10 }
 0x20f   :  { %v1169_v14 = vpop.f32.mrf.mxu2  ;;  %v1218_v22 = vpop.f32.mrf.mxu3 }
 0x210   :  { %v1170_v19 = vadd.f32 %v1169_v14, %v1121_v44  ;;  %v1332_v26 = vadd.f32 %v1289_v61, %v1288_v58 }
 0x212   :  { %v1219_v59 = vadd.f32 %v1218_v22, %v1170_v19  ;;  %1333 = vadd.xlane.f32.xlu0 %v1332_v26  ;;  %v1076_v54 = vpop.f32.mrf.mxu0  ;;  %v1125_v11 = vpop.f32.mrf.mxu1 }
 0x213   :  { %v1077_v42 = vadd.f32 %v1076_v54, %v2725_v32  ;;  %v1294_v32 = vmul.f32 %v2733_v7, %v1256_v27 }
 0x214   :  { %v1253_v29 = vmax.f32 %v1219_v59, 0.0 }
 0x215   :  { %v1126_v41 = vadd.f32 %v1125_v11, %v1077_v42 }
 0x216   :  { %v1291_v55 = vmul.f32 %v2737_v12, %v1253_v29 }
 0x217   :  { %v1172_v34 = vpop.f32.mrf.mxu2  ;;  %v1221_v60 = vpop.f32.mrf.mxu3 }
 0x218   :  { %v1173_v15 = vadd.f32 %v1172_v34, %v1124_v28  ;;  %v1335_v35 = vadd.f32 %v1291_v55, %v1290_v31 }
 0x21a   :  { %v1222_v6 = vadd.f32 %v1221_v60, %v1173_v15  ;;  %1336 = vadd.xlane.f32.xlu1 %v1335_v35 }
 0x21c   :  { %v1255_v9 = vmax.f32 %v1222_v6, 0.0 }
 0x21e   :  { %v1293_v21 = vmul.f32 %v2737_v12, %v1255_v9 }
 0x21f   :  { %v1174_v24 = vpop.f32.mrf.mxu2  ;;  %v1223_v23 = vpop.f32.mrf.mxu3 }
 0x220   :  { %v1175_v47 = vadd.f32 %v1174_v24, %v1126_v41  ;;  %v1338_v37 = vadd.f32 %v1293_v21, %v1292_v40 }
 0x222   :  { %v1224_v25 = vadd.f32 %v1223_v23, %v1175_v47  ;;  %1339 = vadd.xlane.f32.xlu2 %v1338_v37  ;;  %v2847_v47 = vand.u32 127, %v1682_v63 }
 0x224   :  { %v1257_v43 = vmax.f32 %v1224_v25, 0.0 }
 0x225   :  { %v1298_v38 = vpop.xlane.xlu0 %1297 }
 0x226   :  { %v1295_v48 = vmul.f32 %v2737_v12, %v1257_v43  ;;  %v1346_v30 = vadd.f32 %v2803_v51, %v1298_v38  ;;  %v2862_v38 = vadd.s32 4294967288, %v2847_v47 }
 0x228   :  { %v1341_v50 = vadd.f32 %v1295_v48, %v1294_v32  ;;  %v2084_v52 = vmul.f32 -1.442695, %v1346_v30 }
 0x22a   :  { %1342 = vadd.xlane.f32.xlu0 %v1341_v50  ;;  %2176 = vpow2.f32 %v2084_v52 }
 0x22d   :  { %v1301_v46 = vpop.xlane.xlu0 %1300 }
 0x22e   :  { %v1347_v53 = vadd.f32 %v2803_v51, %v1301_v46 }
 0x230   :  { %v2085_v49 = vmul.f32 -1.442695, %v1347_v53  ;;  %v2177_v33 = vpop.eup %2176 }
 0x231   :  { %v2809_v56 = vadd.f32 1.0, %v2177_v33 }
 0x232   :  { %2178 = vpow2.f32 %v2085_v49  ;;  %v2879_v49 = vadd.s32 4294967280, %v2847_v47 }
 0x233   :  { %v1435_v37 = vand.u32 2147483647, %v2809_v56  ;;  %v1437_v23 = vand.u32 2147483648, %v2809_v56  ;;  %vm1431_vm3 = vweird.f32 %v2809_v56 }
 0x235   :  { %v1304_v62 = vpop.xlane.xlu1 %1303  ;;  %vm2873_vm5 = vcmp.eq.f32.partialorder %v1435_v37, 8.507059e+37 }
 0x236   :  { %v1348_v7 = vadd.f32 %v2803_v51, %v1304_v62 }
 0x238   :  { %v2086_v57 = vmul.f32 -1.442695, %v1348_v7  ;;  %v2179_v2 = vpop.eup %2178 }
 0x239   :  { %v2811_v0 = vadd.f32 1.0, %v2179_v2 }
 0x23a   :  { %2180 = vpow2.f32 %v2086_v57  ;;  %v1438_v57 = vor.u32 1.1754944e-38, %v1437_v23 }
 0x23b   :  { %2182 = vrcp.f32 %v2809_v56  ;;  %v1452_v43 = vand.u32 2147483648, %v2811_v0  ;;  %vm1446_vm6 = vweird.f32 %v2811_v0  ;;  %v1450_v33 = vand.u32 2147483647, %v2811_v0 }
 0x23d   :  { %v1307_v45 = vpop.xlane.xlu1 %1306  ;;  %vm1451_vm10 = vcmp.eq.f32.partialorder %v1450_v33, 8.507059e+37 }
 0x23e   :  { %v1349_v1 = vadd.f32 %v2803_v51, %v1307_v45  ;;  %v2974_v45 = vadd.s32 4294967248, %v2847_v47 }
 0x240   :  { %v2087_v3 = vmul.f32 -1.442695, %v1349_v1  ;;  %v2181_v5 = vpop.eup %2180  ;;  %v2889_v1 = vadd.s32 4294967272, %v2847_v47 }
 0x241   :  { %v2817_v8 = vadd.f32 1.0, %v2181_v5  ;;  %v2819_v58 = vpop.eup %2182 }
 0x242   :  { %2184 = vpow2.f32 %v2087_v3  ;;  %v1427_v22 = vmul.f32 %v2819_v58, %v2809_v56  ;;  %vm1432_vm1 = vweird.f32 %v2819_v58 }
 0x243   :  { %2186 = vrcp.f32 %v2811_v0  ;;  %vm2869_vm4 = vmor %vm1431_vm3, %vm1432_vm1  ;;  %vm1461_vm11 = vweird.f32 %v2817_v8  ;;  %vm1695_vm1 = vcmask 261312  }
 0x244   :  { %v1428_v28 = vsub.f32 1.0, %v1427_v22 }
 0x245   :  { %v1310_v12 = vpop.xlane.xlu2 %1309 }
 0x246   :  { %v1350_v16 = vadd.f32 %v2803_v51, %v1310_v12  ;;  %v1429_v42 = vmul.f32 %v2819_v58, %v1428_v28 }
 0x248   :  { %v2088_v39 = vmul.f32 -1.442695, %v1350_v16  ;;  %v2185_v44 = vpop.eup %2184  ;;  %v1430_v25 = vadd.f32 %v2819_v58, %v1429_v42  ;;  %v1453_v16 = vor.u32 1.1754944e-38, %v1452_v43 }
 0x249   :  { %v2823_v14 = vpop.eup %2186  ;;  %v2827_v26 = vadd.f32 1.0, %v2185_v44 }
 0x24a   :  { %2188 = vpow2.f32 %v2088_v39  ;;  %v1442_v36 = vmul.f32 %v2823_v14, %v2811_v0  ;;  %vm1447_vm2 = vweird.f32 %v2823_v14  ;;  %v1434_v56 = vsel %vm2869_vm4, %v2819_v58, %v1430_v25 }
 0x24b   :  { %2190 = vrcp.f32 %v2817_v8  ;;  %vm2883_vm7 = vmor %vm1446_vm6, %vm1447_vm2  ;;  %v1467_v58 = vand.u32 2147483648, %v2817_v8  ;;  %vm1476_vm0 = vweird.f32 %v2827_v26 }
 0x24c   :  { %v1443_v54 = vsub.f32 1.0, %v1442_v36 }
 0x24d   :  { %v1313_v18 = vpop.xlane.xlu2 %1312 }
 0x24e   :  { %v1351_v4 = vadd.f32 %v2803_v51, %v1313_v18  ;;  %v1444_v11 = vmul.f32 %v2823_v14, %v1443_v54  ;;  %v1468_v54 = vor.u32 1.1754944e-38, %v1467_v58 }
 0x250   :  { %v2089_v20 = vmul.f32 -1.442695, %v1351_v4  ;;  %v2189_v59 = vpop.eup %2188  ;;  %v1445_v32 = vadd.f32 %v2823_v14, %v1444_v11 }
 0x251   :  { %v2832_v31 = vpop.eup %2190  ;;  %v2835_v34 = vadd.f32 1.0, %v2189_v59 }
 0x252   :  { %2192 = vpow2.f32 %v2089_v20  ;;  %v1457_v60 = vmul.f32 %v2832_v31, %v2817_v8  ;;  %v1449_v3 = vsel %vm2883_vm7, %v2823_v14, %v1445_v32  ;;  %vm1462_vm9 = vweird.f32 %v2832_v31 }
 0x253   :  { %2194 = vrcp.f32 %v2827_v26  ;;  %v1465_v20 = vand.u32 2147483647, %v2817_v8  ;;  %vm2914_vm13 = vmor %vm1461_vm11, %vm1462_vm9  ;;  %v1495_v23 = vand.u32 2147483647, %v2835_v34  ;;  %v1497_v32 = vand.u32 2147483648, %v2835_v34 }
 0x254   :  { %v1458_v21 = vsub.f32 1.0, %v1457_v60 }
 0x255   :  { %v1316_v10 = vpop.xlane.xlu0 %1315  ;;  %vm1466_vm14 = vcmp.eq.f32.partialorder %v1465_v20, 8.507059e+37  ;;  %vm2979_vm6 = vcmp.eq.f32.partialorder %v1495_v23, 8.507059e+37 }
 0x256   :  { %v1352_v61 = vadd.f32 %v2803_v51, %v1316_v10  ;;  %v1459_v46 = vmul.f32 %v2832_v31, %v1458_v21 }
 0x258   :  { %v2090_v13 = vmul.f32 -1.442695, %v1352_v61  ;;  %v2193_v55 = vpop.eup %2192  ;;  %v1460_v0 = vadd.f32 %v2832_v31, %v1459_v46  ;;  %v1439_v61 = vsel %vm2873_vm5, %v1438_v57, %v1434_v56  ;;  %vm1491_vm5 = vweird.f32 %v2835_v34 }
 0x259   :  { %v2841_v6 = vadd.f32 1.0, %v2193_v55  ;;  %v2845_v41 = vpop.eup %2194  ;;  %v1684_v55 = vperm.slane %v1439_v61, %v2847_v47 }
 0x25a   :  { %2196 = vpow2.f32 %v2090_v13  ;;  %v1472_v48 = vmul.f32 %v2845_v41, %v2827_v26  ;;  %v2920_v13 = vadd.s32 4294967264, %v2847_v47  ;;  %v1464_v8 = vsel %vm2914_vm13, %v2832_v31, %v1460_v0 }
 0x25b   :  { %2198 = vrcp.f32 %v2835_v34  ;;  %v1482_v31 = vand.u32 2147483648, %v2827_v26  ;;  %v1469_v42 = vsel %vm1466_vm14, %v1468_v54, %v1464_v8  ;;  %vm1477_vm15 = vweird.f32 %v2845_v41 }
 0x25c   :  { %v1473_v18 = vsub.f32 1.0, %v1472_v48  ;;  %v1690_v43 = vperm.slane %v1469_v42, %v2879_v49  ;;  %vm2958_vm2 = vmor %vm1476_vm0, %vm1477_vm15  ;;  %vm1506_vm9 = vweird.f32 %v2841_v6 }
 0x25d   :  { %v1319_v19 = vpop.xlane.xlu1 %1318  ;;  %v1483_v52 = vor.u32 1.1754944e-38, %v1482_v31 }
 0x25e   :  { %v1353_v17 = vadd.f32 %v2803_v51, %v1319_v19  ;;  %v1454_v19 = vsel %vm1451_vm10, %v1453_v16, %v1449_v3  ;;  %v1474_v36 = vmul.f32 %v2845_v41, %v1473_v18  ;;  %v2991_v18 = vadd.s32 4294967240, %v2847_v47 }
 0x25f   :  { %v1686_v60 = vperm.slane %v1454_v19, %v2862_v38  ;;  %vm1699_vm10 = vcmask 326912  }
 0x260   :  { %v2091_v35 = vmul.f32 -1.442695, %v1353_v17  ;;  %v2197_v24 = vpop.eup %2196 }
 0x261   :  { %v2865_v30 = vadd.f32 1.0, %v2197_v24  ;;  %v2867_v62 = vpop.eup %2198  ;;  %v1688_v46 = vsel %vm1687_vm8, %v1686_v60, %v1684_v55 }
 0x262   :  { %2200 = vpow2.f32 %v2091_v35  ;;  %v1487_v4 = vmul.f32 %v2867_v62, %v2835_v34  ;;  %v1480_v35 = vand.u32 2147483647, %v2827_v26  ;;  %vm1492_vm4 = vweird.f32 %v2867_v62 }
 0x263   :  { %2202 = vrcp.f32 %v2841_v6  ;;  %v1692_v56 = vsel %vm1691_vm12, %v1690_v43, %v1688_v46  ;;  %vm2986_vm7 = vmor %vm1491_vm5, %vm1492_vm4  ;;  %v1525_v54 = vand.u32 2147483647, %v2865_v30  ;;  %vm1703_vm12 = vcmask 392512  }
 0x264   :  { %v1488_v17 = vsub.f32 1.0, %v1487_v4  ;;  %vm2962_vm3 = vcmp.eq.f32.partialorder %v1480_v35, 8.507059e+37  ;;  %v1527_v35 = vand.u32 2147483648, %v2865_v30  ;;  %vm1521_vm15 = vweird.f32 %v2865_v30 }
 0x265   :  { %v1322_v29 = vpop.xlane.xlu2 %1321  ;;  %v3142_v43 = vadd.s32 4294967208, %v2847_v47 }
 0x266   :  { %v1354_v15 = vadd.f32 %v2803_v51, %v1322_v29  ;;  %v1489_v21 = vmul.f32 %v2867_v62, %v1488_v17 }
 0x268   :  { %v2092_v40 = vmul.f32 -1.442695, %v1354_v15  ;;  %v2201_v12 = vpop.eup %2200 }
 0x269   :  { %v2898_v5 = vpop.eup %2202  ;;  %v2907_v44 = vadd.f32 1.0, %v2201_v12  ;;  %v1490_v12 = vadd.f32 %v2867_v62, %v1489_v21 }
 0x26a   :  { %2204 = vpow2.f32 %v2092_v40  ;;  %v1502_v29 = vmul.f32 %v2898_v5, %v2841_v6  ;;  %vm1507_vm8 = vweird.f32 %v2898_v5 }
 0x26b   :  { %2206 = vrcp.f32 %v2865_v30  ;;  %vm3015_vm11 = vmor %vm1506_vm9, %vm1507_vm8  ;;  %v1540_v46 = vand.u32 2147483647, %v2907_v44  ;;  %vm1711_vm8 = vcmask 523712  }
 0x26c   :  { %v1503_v24 = vsub.f32 1.0, %v1502_v29 }
 0x26d   :  { %v1325_v9 = vpop.xlane.xlu0 %1324 }
 0x26e   :  { %v1355_v27 = vadd.f32 %v2803_v51, %v1325_v9  ;;  %v1475_v9 = vadd.f32 %v2845_v41, %v1474_v36  ;;  %v1504_v57 = vmul.f32 %v2898_v5, %v1503_v24 }
 0x270   :  { %v2093_v7 = vmul.f32 -1.442695, %v1355_v27  ;;  %v2205_v10 = vpop.eup %2204  ;;  %v2945_v27 = vadd.s32 4294967256, %v2847_v47  ;;  %v1505_v20 = vadd.f32 %v2898_v5, %v1504_v57 }
 0x271   :  { %v2928_v28 = vadd.f32 1.0, %v2205_v10  ;;  %v2932_v15 = vpop.eup %2206  ;;  %v1494_v10 = vsel %vm2986_vm7, %v2867_v62, %v1490_v12  ;;  %v1510_v62 = vand.u32 2147483647, %v2841_v6  ;;  %vm3082_vm7 = vcmp.eq.f32.partialorder %v1540_v46, 8.507059e+37 }
 0x272   :  { %2208 = vpow2.f32 %v2093_v7  ;;  %v1517_v25 = vmul.f32 %v2932_v15, %v2865_v30  ;;  %v1479_v7 = vsel %vm2958_vm2, %v2845_v41, %v1475_v9  ;;  %v1498_v41 = vor.u32 1.1754944e-38, %v1497_v32 }
 0x273   :  { %2210 = vrcp.f32 %v2907_v44  ;;  %v1484_v16 = vsel %vm2962_vm3, %v1483_v52, %v1479_v7  ;;  %vm1522_vm13 = vweird.f32 %v2932_v15  ;;  %vm1511_vm14 = vcmp.eq.f32.partialorder %v1510_v62, 8.507059e+37 }
 0x274   :  { %v1518_v33 = vsub.f32 1.0, %v1517_v25  ;;  %v1694_v36 = vperm.slane %v1484_v16, %v2889_v1  ;;  %v1499_v29 = vsel %vm2979_vm6, %v1498_v41, %v1494_v10  ;;  %vm3039_vm0 = vmor %vm1521_vm15, %vm1522_vm13  ;;  %vm3043_vm2 = vcmp.eq.f32.partialorder %v1525_v54, 8.507059e+37 }
 0x275   :  { %v1328_v50 = vpop.xlane.xlu1 %1327  ;;  %v1528_v30 = vor.u32 1.1754944e-38, %v1527_v35  ;;  %vm1707_vm3 = vcmask 458112   ;;  %v1557_v41 = vand.u32 2147483648, %v2928_v28  ;;  %v3087_v10 = vadd.s32 4294967224, %v2847_v47 }
 0x276   :  { %v1356_v2 = vadd.f32 %v2803_v51, %v1328_v50  ;;  %v1519_v19 = vmul.f32 %v2932_v15, %v1518_v33  ;;  %vm1551_vm9 = vweird.f32 %v2928_v28 }
 0x278   :  { %v2094_v14 = vmul.f32 -1.442695, %v1356_v2  ;;  %v2209_v63 = vpop.eup %2208  ;;  %v1520_v42 = vadd.f32 %v2932_v15, %v1519_v19 }
 0x279   :  { %v2951_v48 = vadd.f32 1.0, %v2209_v63  ;;  %v2953_v38 = vpop.eup %2210 }
 0x27a   :  { %2212 = vpow2.f32 %v2094_v14  ;;  %v1532_v0 = vmul.f32 %v2953_v38, %v2907_v44  ;;  %v1512_v14 = vand.u32 2147483648, %v2841_v6  ;;  %v1509_v6 = vsel %vm3015_vm11, %v2898_v5, %v1505_v20 }
 0x27b   :  { %2214 = vrcp.f32 %v2928_v28  ;;  %v1698_v5 = vperm.slane %v1499_v29, %v2920_v13  ;;  %vm1537_vm4 = vweird.f32 %v2953_v38  ;;  %v3090_v20 = vadd.s32 4294967216, %v2847_v47 }
 0x27c   :  { %v1533_v60 = vsub.f32 1.0, %v1532_v0  ;;  %v1513_v63 = vor.u32 1.1754944e-38, %v1512_v14  ;;  %vm1715_vm11 = vcmask 589312   ;;  %v1570_v54 = vand.u32 2147483647, %v2951_v48 }
 0x27d   :  { %v1331_v39 = vpop.xlane.xlu2 %1330 }
 0x27e   :  { %v1357_v59 = vadd.f32 %v2803_v51, %v1331_v39  ;;  %v1514_v21 = vsel %vm1511_vm14, %v1513_v63, %v1509_v6  ;;  %v1534_v24 = vmul.f32 %v2953_v38, %v1533_v60  ;;  %v1572_v60 = vand.u32 2147483648, %v2951_v48 }
 0x27f   :  { %v1702_v52 = vperm.slane %v1514_v21, %v2945_v27  ;;  %vm1566_vm14 = vweird.f32 %v2951_v48 }
 0x280   :  { %v2095_v11 = vmul.f32 -1.442695, %v1357_v59  ;;  %v2213_v49 = vpop.eup %2212  ;;  %v3011_v59 = vadd.s32 4294967232, %v2847_v47  ;;  %v1535_v12 = vadd.f32 %v2953_v38, %v1534_v24 }
 0x281   :  { %v2976_v2 = vpop.eup %2214  ;;  %v2995_v4 = vadd.f32 1.0, %v2213_v49  ;;  %v1542_v49 = vand.u32 2147483648, %v2907_v44 }
 0x282   :  { %2216 = vpow2.f32 %v2095_v11  ;;  %v1547_v22 = vmul.f32 %v2976_v2, %v2928_v28  ;;  %v1696_v11 = vsel %vm1695_vm1, %v1694_v36, %v1692_v56  ;;  %vm1536_vm1 = vweird.f32 %v2907_v44 }
 0x283   :  { %v1555_v56 = vand.u32 2147483647, %v2928_v28  ;;  %vm1552_vm5 = vweird.f32 %v2976_v2  ;;  %v1700_v34 = vsel %vm1699_vm10, %v1698_v5, %v1696_v11  ;;  %vm3078_vm6 = vmor %vm1536_vm1, %vm1537_vm4  ;;  %v1543_v36 = vor.u32 1.1754944e-38, %v1542_v49 }
 0x284   :  { %v1548_v9 = vsub.f32 1.0, %v1547_v22  ;;  %v1539_v44 = vsel %vm3078_vm6, %v2953_v38, %v1535_v12  ;;  %vm3103_vm10 = vmor %vm1551_vm9, %vm1552_vm5  ;;  %v1558_v38 = vor.u32 1.1754944e-38, %v1557_v41  ;;  %v1585_v25 = vand.u32 2147483647, %v2995_v4 }
 0x285   :  { %v1334_v40 = vpop.xlane.xlu0 %1333  ;;  %v1544_v55 = vsel %vm3082_vm7, %v1543_v36, %v1539_v44  ;;  %vm1581_vm1 = vweird.f32 %v2995_v4 }
 0x286   :  { %v1358_v37 = vadd.f32 %v2803_v51, %v1334_v40  ;;  %v1549_v26 = vmul.f32 %v2976_v2, %v1548_v9  ;;  %v1710_v5 = vperm.slane %v1544_v55, %v2991_v18 }
 0x288   :  { %v2096_v50 = vmul.f32 -1.442695, %v1358_v37  ;;  %v2217_v61 = vpop.eup %2216  ;;  %v1550_v3 = vadd.f32 %v2976_v2, %v1549_v26 }
 0x289   :  { %v3027_v31 = vadd.f32 1.0, %v2217_v61 }
 0x28a   :  { %2218 = vpow2.f32 %v2096_v50  ;;  %v1524_v50 = vsel %vm3039_vm0, %v2932_v15, %v1520_v42  ;;  %v1554_v28 = vsel %vm3103_vm10, %v2976_v2, %v1550_v3  ;;  %vm3136_vm0 = vcmp.eq.f32.partialorder %v1570_v54, 8.507059e+37 }
 0x28b   :  { %2220 = vrcp.f32 %v2951_v48  ;;  %v1529_v33 = vsel %vm3043_vm2, %v1528_v30, %v1524_v50  ;;  %v1587_v30 = vand.u32 2147483648, %v2995_v4  ;;  %v1573_v50 = vor.u32 1.1754944e-38, %v1572_v60 }
 0x28c   :  { %2222 = vrcp.f32 %v2995_v4  ;;  %v1706_v22 = vperm.slane %v1529_v33, %v2974_v45  ;;  %v1600_v12 = vand.u32 2147483647, %v3027_v31  ;;  %vm1596_vm5 = vweird.f32 %v3027_v31 }
 0x28d   :  { %v1337_v39 = vpop.xlane.xlu1 %1336 }
 0x28e   :  { %v1359_v58 = vadd.f32 %v2803_v51, %v1337_v39  ;;  %vm3189_vm7 = vcmp.eq.f32.partialorder %v1600_v12, 8.507059e+37 }
 0x290   :  { %v2097_v8 = vmul.f32 -1.442695, %v1359_v58  ;;  %v2219_v17 = vpop.eup %2218  ;;  %v1704_v58 = vsel %vm1703_vm12, %v1702_v52, %v1700_v34  ;;  %vm1556_vm12 = vcmp.eq.f32.partialorder %v1555_v56, 8.507059e+37  ;;  %v1588_v56 = vor.u32 1.1754944e-38, %v1587_v30 }
 0x291   :  { %v3021_v1 = vpop.eup %2220  ;;  %v3033_v40 = vadd.f32 1.0, %v2219_v17  ;;  %v1559_v42 = vsel %vm1556_vm12, %v1558_v38, %v1554_v28  ;;  %v1708_v24 = vsel %vm1707_vm3, %v1706_v22, %v1704_v58  ;;  %vm3161_vm3 = vcmp.eq.f32.partialorder %v1585_v25, 8.507059e+37 }
 0x292   :  { %2224 = vpow2.f32 %v2097_v8  ;;  %v1562_v37 = vmul.f32 %v3021_v1, %v2951_v48  ;;  %v3049_v32 = vpop.eup %2222  ;;  %vm1567_vm13 = vweird.f32 %v3021_v1  ;;  %v1714_v48 = vperm.slane %v1559_v42, %v3011_v59 }
 0x293   :  { %2226 = vrcp.f32 %v3027_v31  ;;  %v1577_v27 = vmul.f32 %v3049_v32, %v2995_v4  ;;  %vm3132_vm15 = vmor %vm1566_vm14, %vm1567_vm13  ;;  %vm1582_vm2 = vweird.f32 %v3049_v32  ;;  %v1712_v52 = vsel %vm1711_vm8, %v1710_v5, %v1708_v24 }
 0x294   :  { %2228 = vrcp.f32 %v3033_v40  ;;  %v1563_v15 = vsub.f32 1.0, %v1562_v37  ;;  %v3155_v59 = vadd.s32 4294967200, %v2847_v47  ;;  %v1602_v4 = vand.u32 2147483648, %v3027_v31  ;;  %vm3169_vm4 = vmor %vm1581_vm1, %vm1582_vm2 }
 0x295   :  { %v1340_v23 = vpop.xlane.xlu2 %1339  ;;  %v1578_v8 = vsub.f32 1.0, %v1577_v27  ;;  %v1716_v41 = vsel %vm1715_vm11, %v1714_v48, %v1712_v52  ;;  %vm1719_vm8 = vcmask 654912   ;;  %v3194_v22 = vadd.s32 4294967192, %v2847_v47 }
 0x296   :  { %v1360_v13 = vadd.f32 %v2803_v51, %v1340_v23  ;;  %v1564_v61 = vmul.f32 %v3021_v1, %v1563_v15  ;;  %vm1611_vm9 = vweird.f32 %v3033_v40  ;;  %vm1723_vm13 = vcmask 720512  }
 0x297   :  { %v1579_v9 = vmul.f32 %v3049_v32, %v1578_v8  ;;  %v1617_v8 = vand.u32 2147483648, %v3033_v40 }
 0x298   :  { %v2225_v53 = vpop.eup %2224  ;;  %v2098_v7 = vmul.f32 -1.442695, %v1360_v13  ;;  %v1565_v35 = vadd.f32 %v3021_v1, %v1564_v61 }
 0x299   :  { %v3062_v57 = vadd.f32 1.0, %v2225_v53  ;;  %v3073_v16 = vpop.eup %2226  ;;  %v1580_v46 = vadd.f32 %v3049_v32, %v1579_v9  ;;  %v1618_v42 = vor.u32 1.1754944e-38, %v1617_v8 }
 0x29a   :  { %2230 = vpow2.f32 %v2098_v7  ;;  %v3098_v19 = vpop.eup %2228  ;;  %v1592_v45 = vmul.f32 %v3073_v16, %v3027_v31  ;;  %v1569_v18 = vsel %vm3132_vm15, %v3021_v1, %v1565_v35  ;;  %vm1597_vm6 = vweird.f32 %v3073_v16 }
 0x29b   :  { %2232 = vrcp.f32 %v3062_v57  ;;  %v1607_v2 = vmul.f32 %v3098_v19, %v3033_v40  ;;  %v3159_v1 = vsel %vm3136_vm0, %v1573_v50, %v1569_v18  ;;  %v1584_v34 = vsel %vm3169_vm4, %v3049_v32, %v1580_v46  ;;  %vm3203_vm11 = vmor %vm1596_vm5, %vm1597_vm6 }
 0x29c   :  { %v1593_v21 = vsub.f32 1.0, %v1592_v45  ;;  %v1718_v58 = vperm.slane %v3159_v1, %v3087_v10  ;;  %v1603_v32 = vor.u32 1.1754944e-38, %v1602_v4  ;;  %v1589_v36 = vsel %vm3161_vm3, %v1588_v56, %v1584_v34 }
 0x29d   :  { %v1343_v14 = vpop.xlane.xlu0 %1342  ;;  %v1608_v13 = vsub.f32 1.0, %v1607_v2  ;;  %vm1612_vm10 = vweird.f32 %v3098_v19  ;;  %v1615_v45 = vand.u32 2147483647, %v3033_v40  ;;  %v1632_v31 = vand.u32 2147483648, %v3062_v57 }
 0x29e   :  { %v1361_v17 = vadd.f32 %v2803_v51, %v1343_v14  ;;  %v1594_v53 = vmul.f32 %v3073_v16, %v1593_v21  ;;  %vm3217_vm15 = vmor %vm1611_vm9, %vm1612_vm10  ;;  %vm1626_vm0 = vweird.f32 %v3062_v57  ;;  %v1630_v55 = vand.u32 2147483647, %v3062_v57 }
 0x29f   :  { %v1609_v27 = vmul.f32 %v3098_v19, %v1608_v13  ;;  %vm1616_vm4 = vcmp.eq.f32.partialorder %v1615_v45, 8.507059e+37  ;;  %v1720_v30 = vsel %vm1719_vm8, %v1718_v58, %v1716_v41  ;;  %vm1727_vm9 = vcmask 786112  }
 0x2a0   :  { %v2231_v29 = vpop.eup %2230  ;;  %v2099_v6 = vmul.f32 -1.442695, %v1361_v17  ;;  %v1595_v44 = vadd.f32 %v3073_v16, %v1594_v53  ;;  %vm1631_vm5 = vcmp.eq.f32.partialorder %v1630_v55, 8.507059e+37  ;;  %vm1731_vm10 = vcmask 851712  }
 0x2a1   :  { %v3117_v51 = vpop.eup %2232  ;;  %v3123_v63 = vadd.f32 1.0, %v2231_v29  ;;  %v1610_v10 = vadd.f32 %v3098_v19, %v1609_v27  ;;  %vm1739_vm8 = vcmask 982912  }
 0x2a2   :  { %v1622_v11 = vmul.f32 %v3117_v51, %v3062_v57  ;;  %2234 = vpow2.f32 %v2099_v6  ;;  %vm1627_vm12 = vweird.f32 %v3117_v51  ;;  %v1599_v38 = vsel %vm3203_vm11, %v3073_v16, %v1595_v44 }
 0x2a3   :  { %2236 = vrcp.f32 %v3123_v63  ;;  %v1647_v54 = vand.u32 2147483648, %v3123_v63  ;;  %v1722_v16 = vperm.slane %v1589_v36, %v3090_v20  ;;  %vm3226_vm2 = vmor %vm1626_vm0, %vm1627_vm12  ;;  %vm1641_vm1 = vweird.f32 %v3123_v63 }
 0x2a4   :  { %v1623_v26 = vsub.f32 1.0, %v1622_v11  ;;  %v1614_v35 = vsel %vm3217_vm15, %v3098_v19, %v1610_v10  ;;  %v1645_v2 = vand.u32 2147483647, %v3123_v63  ;;  %v1604_v57 = vsel %vm3189_vm7, %v1603_v32, %v1599_v38 }
 0x2a5   :  { %v1633_v11 = vor.u32 1.1754944e-38, %v1632_v31  ;;  %v1737_v19 = vadd.s32 4294967184, %v2847_v47  ;;  %v1619_v24 = vsel %vm1616_vm4, %v1618_v42, %v1614_v35  ;;  %v1726_v25 = vperm.slane %v1604_v57, %v3142_v43 }
 0x2a6   :  { %v1624_v0 = vmul.f32 %v3117_v51, %v1623_v26  ;;  %vm1646_vm6 = vcmp.eq.f32.partialorder %v1645_v2, 8.507059e+37  ;;  %v1730_v13 = vperm.slane %v1619_v24, %v3155_v59  ;;  %v1741_v26 = vadd.s32 4294967176, %v2847_v47 }
 0x2a7   :  { %v1724_v53 = vsel %vm1723_vm13, %v1722_v16, %v1720_v30  ;;  %vm1743_vm0 = vcmask 1048512  }
 0x2a8   :  { %v2235_v49 = vpop.eup %2234  ;;  %v1625_v17 = vadd.f32 %v3117_v51, %v1624_v0  ;;  %v1728_v1 = vsel %vm1727_vm9, %v1726_v25, %v1724_v53 }
 0x2a9   :  { %v3167_v15 = vpop.eup %2236  ;;  %v3174_v3 = vadd.f32 1.0, %v2235_v49  ;;  %v1732_v7 = vsel %vm1731_vm10, %v1730_v13, %v1728_v1 }
 0x2aa   :  { %v1637_v39 = vmul.f32 %v3167_v15, %v3123_v63  ;;  %vm1642_vm14 = vweird.f32 %v3167_v15  ;;  %v1629_v20 = vsel %vm3226_vm2, %v3117_v51, %v1625_v17  ;;  %v1648_v63 = vor.u32 1.1754944e-38, %v1647_v54 }
 0x2ab   :  { %2238 = vrcp.f32 %v3174_v3  ;;  %vm1643_vm3 = vmor %vm1641_vm1, %vm1642_vm14  ;;  %v1634_v37 = vsel %vm1631_vm5, %v1633_v11, %v1629_v20  ;;  %v1662_v23 = vand.u32 2147483648, %v3174_v3  ;;  %v1660_v18 = vand.u32 2147483647, %v3174_v3 }
 0x2ac   :  { %v1638_v14 = vsub.f32 1.0, %v1637_v39  ;;  %vm1656_vm11 = vweird.f32 %v3174_v3  ;;  %v1734_v46 = vperm.slane %v1634_v37, %v3194_v22  ;;  %vm1735_vm14 = vcmask 917312  }
 0x2ad   :  { %v1663_v43 = vor.u32 1.1754944e-38, %v1662_v23  ;;  %vm1661_vm15 = vcmp.eq.f32.partialorder %v1660_v18, 8.507059e+37 }
 0x2ae   :  { %v1639_v28 = vmul.f32 %v3167_v15, %v1638_v14  ;;  %v1736_v47 = vsel %vm1735_vm14, %v1734_v46, %v1732_v7 }
 0x2b0   :  { %v1640_v60 = vadd.f32 %v3167_v15, %v1639_v28 }
 0x2b1   :  { %v2239_v6 = vpop.eup %2238 }
 0x2b2   :  { %v1652_v9 = vmul.f32 %v2239_v6, %v3174_v3  ;;  %v1644_v5 = vsel %vm1643_vm3, %v3167_v15, %v1640_v60  ;;  %vm1657_vm7 = vweird.f32 %v2239_v6 }
 0x2b3   :  { %v1649_v48 = vsel %vm1646_vm6, %v1648_v63, %v1644_v5  ;;  %vm1658_vm12 = vmor %vm1656_vm11, %vm1657_vm7 }
 0x2b4   :  { %v1653_v21 = vsub.f32 1.0, %v1652_v9  ;;  %v1738_v52 = vperm.slane %v1649_v48, %v1737_v19 }
 0x2b6   :  { %v1654_v51 = vmul.f32 %v2239_v6, %v1653_v21  ;;  %v1740_v4 = vsel %vm1739_vm8, %v1738_v52, %v1736_v47 }
 0x2b8   :  { %v1655_v50 = vadd.f32 %v2239_v6, %v1654_v51 }
 0x2ba   :  { %v1659_v49 = vsel %vm1658_vm12, %v2239_v6, %v1655_v50 }
 0x2bb   :  { %v1664_v59 = vsel %vm1661_vm15, %v1663_v43, %v1659_v49 }
 0x2bc   :  { %v1742_v12 = vperm.slane %v1664_v59, %v1741_v26 }
 0x2be   :  { %v1744_v15 = vsel %vm1743_vm0, %v1742_v12, %v1740_v4 }
 0x2bf   :  { %1746 = vst [vmem:[#allocation6] sm:$0x1] %v1744_v15 }
 0x2c0   :  { %1757 = dma.vmem_to_hbm [thread:$0]  %s1753_s25, 16, %s1755_s28, [#allocation5]  }
 0x2c1   :  { %2290 = dma.done.wait [#allocation5], 16  }
 0x2c2   :  { %2291 = vsyncadd [#allocation5], 4294967280 }
 0x2c3   :  { %1762 = vsyncpa [#allocation4], 1 }
 0x2c4   :  { %1763 = vsyncpa [#allocation5], 1 }

</bundles_post_ra>
